<compile_context>
chip_gen: v7x
topology: tpu7x:2x2x1
jax: 0.10.0
libtpu: 0.0.40
codegen_flags: <defaults>
</compile_context>

<pallas_src>
import math
import functools

import jax
import jax.numpy as jnp
from jax import lax
from jax.experimental import pallas as pl
from jax.experimental.pallas import tpu as pltpu


# ----------------------------------------------------------------------------
# Pass 1: GroupNorm statistics (per batch element, tiled over spatial axis).
# x is read as (C, ts) tiles; per-channel sums accumulate as (C, 1) columns.
# ----------------------------------------------------------------------------
def _gn_stats_kernel(x_ref, gamma_ref, beta_ref, onehot_ref, onehot_t_ref,
                     ss_ref, sum_ref, sq_ref, *, n_elem, eps):
    si = pl.program_id(1)
    ns = pl.num_programs(1)

    @pl.when(si == 0)
    def _():
        sum_ref[...] = jnp.zeros_like(sum_ref)
        sq_ref[...] = jnp.zeros_like(sq_ref)

    x = x_ref[0].astype(jnp.float32)                         # (C, ts)
    sum_ref[...] += jnp.sum(x, axis=1, keepdims=True)        # (C, 1)
    sq_ref[...] += jnp.sum(x * x, axis=1, keepdims=True)     # (C, 1)

    @pl.when(si == ns - 1)
    def _():
        hp = lax.Precision.HIGHEST                           # tiny, keep exact
        onehot = onehot_ref[...]                             # (C, G)
        onehot_t = onehot_t_ref[...]                         # (G, C)
        g_sum = jnp.dot(onehot_t, sum_ref[...], precision=hp,
                        preferred_element_type=jnp.float32)         # (G, 1)
        g_sq = jnp.dot(onehot_t, sq_ref[...], precision=hp,
                       preferred_element_type=jnp.float32)          # (G, 1)
        g_mean = g_sum / n_elem
        # NOTE: single-pass E[x^2]-E[x]^2 in f32 (PyTorch-GN biased variance);
        # fine for roughly zero-centered activations.
        g_var = g_sq / n_elem - g_mean * g_mean
        g_inv = lax.rsqrt(g_var + eps)
        mean_c = jnp.dot(onehot, g_mean, precision=hp,
                         preferred_element_type=jnp.float32)        # (C, 1)
        inv_c = jnp.dot(onehot, g_inv, precision=hp,
                        preferred_element_type=jnp.float32)         # (C, 1)
        # Folded affine: xn = x * scale_c + shift_c
        scale_c = inv_c * gamma_ref[...]
        shift_c = beta_ref[...] - mean_c * scale_c
        ss_ref[0, :, 0:1] = scale_c                                  # (C, 1)
        ss_ref[0, :, 1:2] = shift_c                                  # (C, 1)


# ----------------------------------------------------------------------------
# Pass 2: normalize + single fused qkv projection, K written pre-transposed.
# ----------------------------------------------------------------------------
def _gn_qkv_kernel(x_ref, ss_ref, w_ref, q_ref, k_ref, v_ref,
                   *, n_head, hd, C, compute_dtype, mm_prec):
    x_ct = x_ref[0].astype(jnp.float32)                      # (C, ts)
    ss = ss_ref[0]                                           # (C, 2)
    xn_ct = x_ct * ss[:, 0:1] + ss[:, 1:2]                   # (C, ts) f32
    xn = jnp.transpose(xn_ct).astype(compute_dtype)          # (ts, C)  XLU

    # One wide matmul: columns are [q(all heads) | k(all heads) | v(all heads)]
    # with the 1/sqrt(C) softmax scale already folded into the q columns.
    qkv = jnp.dot(xn, w_ref[...], precision=mm_prec,
                  preferred_element_type=jnp.float32)        # (ts, 3C) f32

    q_slab = qkv[:, 0:C].astype(compute_dtype)               # (ts, C)
    v_slab = qkv[:, 2 * C:3 * C].astype(compute_dtype)       # (ts, C)
    k_slab_t = jnp.transpose(qkv[:, C:2 * C]).astype(compute_dtype)  # (C, ts)

    for h in range(n_head):                                  # small, unrolled
        q_ref[0, h] = q_slab[:, h * hd:(h + 1) * hd]         # (ts, hd)
        v_ref[0, h] = v_slab[:, h * hd:(h + 1) * hd]         # (ts, hd)
        k_ref[0, h] = k_slab_t[h * hd:(h + 1) * hd, :]       # (hd, ts)


# ----------------------------------------------------------------------------
# Pass 3: flash attention (K already transposed) + per-head out-projection +
# bias + residual, output written lane-dense as (C, tq) tiles.
# grid = (B, q_tiles, heads, kv_tiles); heads & kv are accumulation axes.
# ----------------------------------------------------------------------------
def _flash_attn_out_kernel(q_ref, k_ref, v_ref, wout_ref, bout_ref, x_ref,
                           out_ref, m_ref, l_ref, acc_h_ref, acc_o_ref,
                           *, mm_prec, approx_recip, single_kv):
    h = pl.program_id(2)
    ki = pl.program_id(3)
    nh = pl.num_programs(2)
    nk = pl.num_programs(3)

    @pl.when((h == 0) & (ki == 0))
    def _():
        acc_o_ref[...] = jnp.zeros_like(acc_o_ref)

    q = q_ref[0, 0]                                          # (tq, hd)
    kt = k_ref[0, 0]                                         # (hd, tk)
    v = v_ref[0, 0]                                          # (tk, hd)

    # Plain matmul: K is pre-transposed, no rhs relayout per kv step.
    s = jnp.dot(q, kt, precision=mm_prec,
                preferred_element_type=jnp.float32)          # (tq, tk)

    if single_kv:
        # nk == 1: one-shot softmax, no online rescale, no m/l scratch traffic.
        m = jnp.max(s, axis=-1, keepdims=True)
        p = jnp.exp(s - m)
        l = jnp.sum(p, axis=-1, keepdims=True)
        o_h = jnp.dot(p.astype(v.dtype), v, precision=mm_prec,
                      preferred_element_type=jnp.float32)    # (tq, hd)
        o_h = (o_h * pl.reciprocal(l, approx=approx_recip)).astype(wout_ref.dtype)
        acc_o_ref[...] += jnp.dot(o_h, wout_ref[0], precision=mm_prec,
                                  preferred_element_type=jnp.float32)
    else:
        @pl.when(ki == 0)
        def _():
            m_ref[...] = jnp.full_like(m_ref, -jnp.inf)
            l_ref[...] = jnp.zeros_like(l_ref)
            acc_h_ref[...] = jnp.zeros_like(acc_h_ref)

        m_prev = m_ref[...]
        m_new = jnp.maximum(m_prev, jnp.max(s, axis=-1, keepdims=True))
        alpha = jnp.exp(m_prev - m_new)
        p = jnp.exp(s - m_new)
        l_ref[...] = alpha * l_ref[...] + jnp.sum(p, axis=-1, keepdims=True)
        acc_h_ref[...] = alpha * acc_h_ref[...] + jnp.dot(
            p.astype(v.dtype), v, precision=mm_prec,
            preferred_element_type=jnp.float32)
        m_ref[...] = m_new

        @pl.when(ki == nk - 1)
        def _():
            inv_l = pl.reciprocal(l_ref[...], approx=approx_recip)   # (tq, 1)
            o_h = (acc_h_ref[...] * inv_l).astype(wout_ref.dtype)    # (tq, hd)
            acc_o_ref[...] += jnp.dot(o_h, wout_ref[0], precision=mm_prec,
                                      preferred_element_type=jnp.float32)

    @pl.when((h == nh - 1) & (ki == nk - 1))
    def _():
        y_t = jnp.transpose(acc_o_ref[...])                  # (C, tq) f32, XLU
        y_t = y_t + bout_ref[...] + x_ref[0].astype(jnp.float32)     # residual
        out_ref[0] = y_t.astype(out_ref.dtype)               # lane-dense store


# ----------------------------------------------------------------------------
# Wrapper
# ----------------------------------------------------------------------------
def _pick_tile(size, cap, mult=128):
    """Largest multiple of `mult` dividing `size` and <= cap; else full size.
    Spatial tiles sit on the lane axis, so they must be 128-multiples (or S).
    NOTE: if S has no such divisor we fall back to one full-S tile."""
    if size <= cap:
        return size
    best = None
    for cand in range(mult, cap + 1, mult):
        if size % cand == 0:
            best = cand
    return best if best is not None else size


def self_attention_pallas(x_nchw, params, *, n_head, norm_groups, eps=1e-5,
                          compute_dtype=jnp.bfloat16,
                          q_tile=512, kv_tile=None, s_tile=1024):
    B, C, H, W = x_nchw.shape
    S = H * W
    assert C % n_head == 0 and C % norm_groups == 0
    hd = C // n_head
    cg = C // norm_groups
    in_dtype = x_nchw.dtype
    use_bf16 = (compute_dtype == jnp.bfloat16)
    mm_prec = lax.Precision.DEFAULT if use_bf16 else lax.Precision.HIGHEST
    approx_recip = use_bf16
    itemsize = jnp.dtype(compute_dtype).itemsize

    # Keep x in its native (B, C, S) layout: no XLA transposes, only a reshape.
    x_bcs = x_nchw.reshape(B, C, S)

    # v7x megacore: only (B, nq) are parallel axes in Pass 3; keep nq >= 2.
    if B == 1:
        q_tile = min(q_tile, max(128, S // 2))

    # kv_tile=None -> take the whole sequence when K+V (double-buffered) fit
    # comfortably: nk == 1 collapses the online-softmax rescale path.
    if kv_tile is None:
        kv_tile = 512
        if 4 * S * hd * itemsize <= 8 * 1024 * 1024:
            kv_tile = S

    ts = _pick_tile(S, s_tile)
    tq = _pick_tile(S, q_tile)
    tk = _pick_tile(S, kv_tile)
    ns, nq, nk = S // ts, S // tq, S // tk

    # Scoped-VMEM ceiling: defaults are 16/32 MiB; raise, but stay inside the
    # 64 MiB physical VMEM of v7x (v5e/v6e have 128 MiB).
    vmem_limit = 64 * 1024 * 1024

    # ---- host-side parameter repacking (layout work kept off the TPU) ----
    gamma_col = params["gamma"].reshape(C, 1).astype(jnp.float32)
    beta_col = params["beta"].reshape(C, 1).astype(jnp.float32)
    onehot = (jnp.arange(C)[:, None] // cg ==
              jnp.arange(norm_groups)[None, :]).astype(jnp.float32)  # (C, G)
    onehot_t = jnp.transpose(onehot)                                  # (G, C)

    # qkv conv weight (3C, C); output channel o = h*3*hd + {q,k,v}*hd + d.
    # Repack as one (C_in, 3C) slab: [q(all heads) | k | v], head-major cols.
    w = params["w_qkv"].reshape(n_head, 3, hd, C).astype(jnp.float32)
    scale = 1.0 / math.sqrt(C)                 # module scales by 1/sqrt(channel)
    w_q = jnp.transpose(w[:, 0], (2, 0, 1)).reshape(C, C) * scale
    w_k = jnp.transpose(w[:, 1], (2, 0, 1)).reshape(C, C)
    w_v = jnp.transpose(w[:, 2], (2, 0, 1)).reshape(C, C)
    w_packed = jnp.concatenate([w_q, w_k, w_v], axis=1).astype(compute_dtype)

    # out conv weight (C_out, C_in): split the contraction axis per head.
    wout_heads = jnp.transpose(params["w_out"].reshape(C, C), (1, 0)) \
        .reshape(n_head, hd, C).astype(compute_dtype)                 # (nh,hd,C)
    bout_col = params["b_out"].reshape(C, 1).astype(jnp.float32)

    # ---- pass 1: GroupNorm statistics -> folded per-channel (scale, shift) ----
    ss = pl.pallas_call(
        functools.partial(_gn_stats_kernel, n_elem=float(S * cg), eps=eps),
        out_shape=jax.ShapeDtypeStruct((B, C, 2), jnp.float32),
        grid_spec=pltpu.PrefetchScalarGridSpec(
            num_scalar_prefetch=0,
            grid=(B, ns),
            in_specs=[
                pl.BlockSpec((1, C, ts), lambda b, si: (b, 0, si)),
                pl.BlockSpec((C, 1), lambda b, si: (0, 0)),
                pl.BlockSpec((C, 1), lambda b, si: (0, 0)),
                pl.BlockSpec((C, norm_groups), lambda b, si: (0, 0)),
                pl.BlockSpec((norm_groups, C), lambda b, si: (0, 0)),
            ],
            out_specs=pl.BlockSpec((1, C, 2), lambda b, si: (b, 0, 0)),
            scratch_shapes=[pltpu.VMEM((C, 1), jnp.float32),
                            pltpu.VMEM((C, 1), jnp.float32)],
        ),
        compiler_params=pltpu.CompilerParams(
            dimension_semantics=("parallel", "arbitrary")),
    )(x_bcs, gamma_col, beta_col, onehot, onehot_t)

    # ---- pass 2: normalize + fused qkv projection (K pre-transposed) ----
    qv_shape = jax.ShapeDtypeStruct((B, n_head, S, hd), compute_dtype)
    kT_shape = jax.ShapeDtypeStruct((B, n_head, hd, S), compute_dtype)
    q, k_t, v = pl.pallas_call(
        functools.partial(_gn_qkv_kernel, n_head=n_head, hd=hd, C=C,
                          compute_dtype=compute_dtype, mm_prec=mm_prec),
        out_shape=(qv_shape, kT_shape, qv_shape),
        grid_spec=pltpu.PrefetchScalarGridSpec(
            num_scalar_prefetch=0,
            grid=(B, ns),
            in_specs=[
                pl.BlockSpec((1, C, ts), lambda b, si: (b, 0, si)),
                pl.BlockSpec((1, C, 2), lambda b, si: (b, 0, 0)),
                pl.BlockSpec((C, 3 * C), lambda b, si: (0, 0)),
            ],
            out_specs=(
                pl.BlockSpec((1, n_head, ts, hd), lambda b, si: (b, 0, si, 0)),
                pl.BlockSpec((1, n_head, hd, ts), lambda b, si: (b, 0, 0, si)),
                pl.BlockSpec((1, n_head, ts, hd), lambda b, si: (b, 0, si, 0)),
            ),
        ),
        compiler_params=pltpu.CompilerParams(
            dimension_semantics=("parallel", "parallel"),
            vmem_limit_bytes=vmem_limit),
    )(x_bcs, ss, w_packed)

    # ---- pass 3: flash attention + out conv + bias + residual (fused) ----
    out_bcs = pl.pallas_call(
        functools.partial(_flash_attn_out_kernel, mm_prec=mm_prec,
                          approx_recip=approx_recip, single_kv=(nk == 1)),
        out_shape=jax.ShapeDtypeStruct((B, C, S), in_dtype),
        grid_spec=pltpu.PrefetchScalarGridSpec(
            num_scalar_prefetch=0,
            grid=(B, nq, n_head, nk),
            in_specs=[
                pl.BlockSpec((1, 1, tq, hd), lambda b, qi, h, ki: (b, h, qi, 0)),
                pl.BlockSpec((1, 1, hd, tk), lambda b, qi, h, ki: (b, h, 0, ki)),
                pl.BlockSpec((1, 1, tk, hd), lambda b, qi, h, ki: (b, h, ki, 0)),
                pl.BlockSpec((1, hd, C), lambda b, qi, h, ki: (h, 0, 0)),
                pl.BlockSpec((C, 1), lambda b, qi, h, ki: (0, 0)),
                pl.BlockSpec((1, C, tq), lambda b, qi, h, ki: (b, 0, qi)),
            ],
            out_specs=pl.BlockSpec((1, C, tq), lambda b, qi, h, ki: (b, 0, qi)),
            scratch_shapes=[
                pltpu.VMEM((tq, 1), jnp.float32),     # running row max m
                pltpu.VMEM((tq, 1), jnp.float32),     # running denominator l
                pltpu.VMEM((tq, hd), jnp.float32),    # per-head accumulator
                pltpu.VMEM((tq, C), jnp.float32),     # out-projection accumulator
            ],
        ),
        compiler_params=pltpu.CompilerParams(
            dimension_semantics=("parallel", "parallel", "arbitrary", "arbitrary"),
            vmem_limit_bytes=vmem_limit),
    )(q, k_t, v, wout_heads, bout_col, x_bcs)

    return out_bcs.reshape(B, C, H, W)


# ----------------------------------------------------------------------------
# Pure-JAX reference mirroring the PyTorch module exactly (f32, high precision)
# ----------------------------------------------------------------------------
def self_attention_reference(x, params, *, n_head, norm_groups, eps=1e-5):
    B, C, H, W = x.shape
    hd = C // n_head
    hp = lax.Precision.HIGHEST
    gamma, beta = params["gamma"], params["beta"]
    wqkv = params["w_qkv"].reshape(3 * C, C)
    wout = params["w_out"].reshape(C, C)
    bout = params["b_out"]

    xg = x.reshape(B, norm_groups, C // norm_groups, H, W)
    mean = xg.mean(axis=(2, 3, 4), keepdims=True)
    var = xg.var(axis=(2, 3, 4), keepdims=True)
    xn = ((xg - mean) / jnp.sqrt(var + eps)).reshape(B, C, H, W)
    xn = xn * gamma[None, :, None, None] + beta[None, :, None, None]

    qkv = jnp.einsum('oc,bchw->bohw', wqkv, xn,
                     precision=hp).reshape(B, n_head, 3 * hd, H, W)
    q, k, v = jnp.split(qkv, 3, axis=2)
    attn = jnp.einsum('bnchw,bncyx->bnhwyx', q, k, precision=hp) / math.sqrt(C)
    attn = jax.nn.softmax(attn.reshape(B, n_head, H, W, H * W), axis=-1)
    attn = attn.reshape(B, n_head, H, W, H, W)
    o = jnp.einsum('bnhwyx,bncyx->bnchw', attn, v,
                   precision=hp).reshape(B, C, H, W)
    o = jnp.einsum('oc,bchw->bohw', wout, o,
                   precision=hp) + bout[None, :, None, None]
    return o + x


if __name__ == "__main__":
    B, C, H, W = 2, 128, 16, 16            # S = 256, lane-dense channel dim
    n_head = 2                             # head_dim = 64
    norm_groups = 32

    key = jax.random.PRNGKey(0)
    kx, kq, ko, kb, kg, kbe = jax.random.split(key, 6)
    x = jax.random.normal(kx, (B, C, H, W), jnp.float32)
    params = {
        "w_qkv": jax.random.normal(kq, (3 * C, C, 1, 1), jnp.float32) / math.sqrt(C),
        "w_out": jax.random.normal(ko, (C, C, 1, 1), jnp.float32) / math.sqrt(C),
        "b_out": jax.random.normal(kb, (C,), jnp.float32) * 0.1,
        "gamma": 1.0 + 0.1 * jax.random.normal(kg, (C,), jnp.float32),
        "beta": 0.1 * jax.random.normal(kbe, (C,), jnp.float32),
    }

    ref = jax.block_until_ready(
        self_attention_reference(x, params, n_head=n_head,
                                 norm_groups=norm_groups))

    # Tight correctness check (f32 MXU operands); small tiles force the
    # multi-tile GN-stats path and the multi-kv online-softmax path
    # (ns = nq = nk = 2).
    out_f32 = jax.block_until_ready(self_attention_pallas(
        x, params, n_head=n_head, norm_groups=norm_groups,
        compute_dtype=jnp.float32, q_tile=128, kv_tile=128, s_tile=128))
    err_f32 = float(jnp.max(jnp.abs(out_f32 - ref)))
    assert out_f32.shape == (B, C, H, W)
    assert err_f32 < 1e-3, f"f32 path max abs error too large: {err_f32}"

    # Production path: bf16 operands, auto kv_tile (= S here -> single-kv
    # fast path, nk = 1), default-ish q tile.
    out_bf16 = jax.block_until_ready(self_attention_pallas(
        x, params, n_head=n_head, norm_groups=norm_groups,
        compute_dtype=jnp.bfloat16, q_tile=128, s_tile=128))
    err_bf16 = float(jnp.max(jnp.abs(out_bf16 - ref)))
    assert err_bf16 < 2e-1, f"bf16 path max abs error too large: {err_bf16}"

    print("KERNEL_OK")
</pallas_src>

<mosaic_0001>
module attributes {stable_mosaic.version = 11 : i64} {
  func.func @_gn_stats_kernel(%arg0: i32, %arg1: i32, %arg2: memref<1x128x128xf32, #tpu.memory_space<vmem>>, %arg3: memref<128x1xf32, #tpu.memory_space<vmem>>, %arg4: memref<128x1xf32, #tpu.memory_space<vmem>>, %arg5: memref<128x32xf32, #tpu.memory_space<vmem>>, %arg6: memref<32x128xf32, #tpu.memory_space<vmem>>, %arg7: memref<1x128x2xf32, #tpu.memory_space<vmem>>, %arg8: memref<128x1xf32, #tpu.memory_space<vmem>>, %arg9: memref<128x1xf32, #tpu.memory_space<vmem>>) attributes {dimension_semantics = [#tpu.dimension_semantics<parallel>, #tpu.dimension_semantics<arbitrary>], iteration_bounds = array<i64: 2, 2>, scalar_prefetch = 0 : i64, scratch_operands = 2 : i64, tpu.core_type = #tpu.core_type<tc>, window_params = [{transform_indices = @transform_0, window_bounds = array<i64: 1, 128, 128>}, {pipeline_mode = #tpu.pipeline_mode<synchronous>, transform_indices = @transform_1, window_bounds = array<i64: 128, 1>}, {pipeline_mode = #tpu.pipeline_mode<synchronous>, transform_indices = @transform_2, window_bounds = array<i64: 128, 1>}, {pipeline_mode = #tpu.pipeline_mode<synchronous>, transform_indices = @transform_3, window_bounds = array<i64: 128, 32>}, {pipeline_mode = #tpu.pipeline_mode<synchronous>, transform_indices = @transform_4, window_bounds = array<i64: 32, 128>}, {transform_indices = @transform_5, window_bounds = array<i64: 1, 128, 2>}]} {
    %c0_i32 = arith.constant 0 : i32
    %0 = arith.cmpi eq, %arg1, %c0_i32 : i32
    %1 = arith.extui %0 : i1 to i32
    %c0_i32_0 = arith.constant 0 : i32
    %2 = arith.cmpi ne, %1, %c0_i32_0 : i32
    scf.if %2 {
      %cst_13 = arith.constant 0.000000e+00 : f32
      %19 = vector.broadcast %cst_13 : f32 to vector<128x1xf32>
      %c0_14 = arith.constant 0 : index
      %c0_15 = arith.constant 0 : index
      %20 = vector.load %arg8[%c0_14, %c0_15] : memref<128x1xf32, #tpu.memory_space<vmem>>, vector<128x1xf32>
      tpu.vector_store %arg8[%c0_14, %c0_15], %19 {strides = array<i32>} : memref<128x1xf32, #tpu.memory_space<vmem>>, vector<128x1xf32>,
      %cst_16 = arith.constant 0.000000e+00 : f32
      %21 = vector.broadcast %cst_16 : f32 to vector<128x1xf32>
      %c0_17 = arith.constant 0 : index
      %c0_18 = arith.constant 0 : index
      %22 = vector.load %arg9[%c0_17, %c0_18] : memref<128x1xf32, #tpu.memory_space<vmem>>, vector<128x1xf32>
      tpu.vector_store %arg9[%c0_17, %c0_18], %21 {strides = array<i32>} : memref<128x1xf32, #tpu.memory_space<vmem>>, vector<128x1xf32>,
    } else {
    }
    %c0 = arith.constant 0 : index
    %c0_1 = arith.constant 0 : index
    %c0_2 = arith.constant 0 : index
    %3 = vector.load %arg2[%c0, %c0_1, %c0_2] : memref<1x128x128xf32, #tpu.memory_space<vmem>>, vector<1x128x128xf32>
    %4 = vector.shape_cast %3 : vector<1x128x128xf32> to vector<128x128xf32>
    %c0_3 = arith.constant 0 : index
    %c0_4 = arith.constant 0 : index
    %5 = vector.load %arg8[%c0_3, %c0_4] : memref<128x1xf32, #tpu.memory_space<vmem>>, vector<128x1xf32>
    %cst = arith.constant dense<0.000000e+00> : vector<128xf32>
    %6 = vector.multi_reduction <add>, %4, %cst [1] : vector<128x128xf32> to vector<128xf32>
    %7 = vector.shape_cast %6 : vector<128xf32> to vector<128x1xf32>
    %8 = arith.addf %5, %7 : vector<128x1xf32>
    %c0_5 = arith.constant 0 : index
    %c0_6 = arith.constant 0 : index
    %9 = vector.load %arg8[%c0_5, %c0_6] : memref<128x1xf32, #tpu.memory_space<vmem>>, vector<128x1xf32>
    tpu.vector_store %arg8[%c0_5, %c0_6], %8 {strides = array<i32>} : memref<128x1xf32, #tpu.memory_space<vmem>>, vector<128x1xf32>,
    %c0_7 = arith.constant 0 : index
    %c0_8 = arith.constant 0 : index
    %10 = vector.load %arg9[%c0_7, %c0_8] : memref<128x1xf32, #tpu.memory_space<vmem>>, vector<128x1xf32>
    %11 = arith.mulf %4, %4 : vector<128x128xf32>
    %cst_9 = arith.constant dense<0.000000e+00> : vector<128xf32>
    %12 = vector.multi_reduction <add>, %11, %cst_9 [1] : vector<128x128xf32> to vector<128xf32>
    %13 = vector.shape_cast %12 : vector<128xf32> to vector<128x1xf32>
    %14 = arith.addf %10, %13 : vector<128x1xf32>
    %c0_10 = arith.constant 0 : index
    %c0_11 = arith.constant 0 : index
    %15 = vector.load %arg9[%c0_10, %c0_11] : memref<128x1xf32, #tpu.memory_space<vmem>>, vector<128x1xf32>
    tpu.vector_store %arg9[%c0_10, %c0_11], %14 {strides = array<i32>} : memref<128x1xf32, #tpu.memory_space<vmem>>, vector<128x1xf32>,
    %c1_i32 = arith.constant 1 : i32
    %16 = arith.cmpi eq, %arg1, %c1_i32 : i32
    %17 = arith.extui %16 : i1 to i32
    %c0_i32_12 = arith.constant 0 : i32
    %18 = arith.cmpi ne, %17, %c0_i32_12 : i32
    scf.if %18 {
      %c0_13 = arith.constant 0 : index
      %c0_14 = arith.constant 0 : index
      %19 = vector.load %arg5[%c0_13, %c0_14] : memref<128x32xf32, #tpu.memory_space<vmem>>, vector<128x32xf32>
      %c0_15 = arith.constant 0 : index
      %c0_16 = arith.constant 0 : index
      %20 = vector.load %arg6[%c0_15, %c0_16] : memref<32x128xf32, #tpu.memory_space<vmem>>, vector<32x128xf32>
      %c0_17 = arith.constant 0 : index
      %c0_18 = arith.constant 0 : index
      %21 = vector.load %arg8[%c0_17, %c0_18] : memref<128x1xf32, #tpu.memory_space<vmem>>, vector<128x1xf32>
      %cst_19 = arith.constant dense<0.000000e+00> : vector<32x1xf32>
      %22 = tpu.matmul %20, %21, %cst_19 {dimension_numbers = #tpu.dot_dimension_numbers<[1], [0], [0], [1], [0, 0, 1, 1], [], []>, precision = #tpu.contract_precision<fp32>} : vector<32x128xf32>, vector<128x1xf32>, vector<32x1xf32> -> vector<32x1xf32>
      %c0_20 = arith.constant 0 : index
      %c0_21 = arith.constant 0 : index
      %23 = vector.load %arg9[%c0_20, %c0_21] : memref<128x1xf32, #tpu.memory_space<vmem>>, vector<128x1xf32>
      %cst_22 = arith.constant dense<0.000000e+00> : vector<32x1xf32>
      %24 = tpu.matmul %20, %23, %cst_22 {dimension_numbers = #tpu.dot_dimension_numbers<[1], [0], [0], [1], [0, 0, 1, 1], [], []>, precision = #tpu.contract_precision<fp32>} : vector<32x128xf32>, vector<128x1xf32>, vector<32x1xf32> -> vector<32x1xf32>
      %cst_23 = arith.constant 1.024000e+03 : f32
      %25 = vector.broadcast %cst_23 : f32 to vector<32x1xf32>
      %26 = arith.divf %22, %25 : vector<32x1xf32>
      %cst_24 = arith.constant 1.024000e+03 : f32
      %27 = vector.broadcast %cst_24 : f32 to vector<32x1xf32>
      %28 = arith.divf %24, %27 : vector<32x1xf32>
      %29 = arith.mulf %26, %26 : vector<32x1xf32>
      %30 = arith.subf %28, %29 : vector<32x1xf32>
      %cst_25 = arith.constant 9.99999974E-6 : f32
      %31 = vector.broadcast %cst_25 : f32 to vector<32x1xf32>
      %32 = arith.addf %30, %31 : vector<32x1xf32>
      %33 = math.rsqrt %32 : vector<32x1xf32>
      %cst_26 = arith.constant dense<0.000000e+00> : vector<128x1xf32>
      %34 = tpu.matmul %19, %26, %cst_26 {dimension_numbers = #tpu.dot_dimension_numbers<[1], [0], [0], [1], [0, 0, 1, 1], [], []>, precision = #tpu.contract_precision<fp32>} : vector<128x32xf32>, vector<32x1xf32>, vector<128x1xf32> -> vector<128x1xf32>
      %cst_27 = arith.constant dense<0.000000e+00> : vector<128x1xf32>
      %35 = tpu.matmul %19, %33, %cst_27 {dimension_numbers = #tpu.dot_dimension_numbers<[1], [0], [0], [1], [0, 0, 1, 1], [], []>, precision = #tpu.contract_precision<fp32>} : vector<128x32xf32>, vector<32x1xf32>, vector<128x1xf32> -> vector<128x1xf32>
      %c0_28 = arith.constant 0 : index
      %c0_29 = arith.constant 0 : index
      %36 = vector.load %arg3[%c0_28, %c0_29] : memref<128x1xf32, #tpu.memory_space<vmem>>, vector<128x1xf32>
      %37 = arith.mulf %35, %36 : vector<128x1xf32>
      %c0_30 = arith.constant 0 : index
      %c0_31 = arith.constant 0 : index
      %38 = vector.load %arg4[%c0_30, %c0_31] : memref<128x1xf32, #tpu.memory_space<vmem>>, vector<128x1xf32>
      %39 = arith.mulf %34, %37 : vector<128x1xf32>
      %40 = arith.subf %38, %39 : vector<128x1xf32>
      %c0_32 = arith.constant 0 : index
      %c0_33 = arith.constant 0 : index
      %c0_34 = arith.constant 0 : index
      %41 = vector.load %arg7[%c0_32, %c0_33, %c0_34] : memref<1x128x2xf32, #tpu.memory_space<vmem>>, vector<1x128x1xf32>
      %42 = vector.shape_cast %41 : vector<1x128x1xf32> to vector<128x1xf32>
      %43 = vector.shape_cast %37 : vector<128x1xf32> to vector<1x128x1xf32>
      tpu.vector_store %arg7[%c0_32, %c0_33, %c0_34], %43 {strides = array<i32>} : memref<1x128x2xf32, #tpu.memory_space<vmem>>, vector<1x128x1xf32>,
      %c0_35 = arith.constant 0 : index
      %c0_36 = arith.constant 0 : index
      %c1 = arith.constant 1 : index
      %44 = vector.load %arg7[%c0_35, %c0_36, %c1] : memref<1x128x2xf32, #tpu.memory_space<vmem>>, vector<1x128x1xf32>
      %45 = vector.shape_cast %44 : vector<1x128x1xf32> to vector<128x1xf32>
      %46 = vector.shape_cast %40 : vector<128x1xf32> to vector<1x128x1xf32>
      tpu.vector_store %arg7[%c0_35, %c0_36, %c1], %46 {strides = array<i32>} : memref<1x128x2xf32, #tpu.memory_space<vmem>>, vector<1x128x1xf32>,
    } else {
    }
    return
  }
  func.func @transform_0(%arg0: i32, %arg1: i32) -> (i32, i32, i32) {
    %c0_i32 = arith.constant 0 : i32
    %c0_i32_0 = arith.constant 0 : i32
    return %arg0, %c0_i32, %arg1 : i32, i32, i32
  }
  func.func @transform_1(%arg0: i32, %arg1: i32) -> (i32, i32) {
    %c0_i32 = arith.constant 0 : i32
    %c0_i32_0 = arith.constant 0 : i32
    %c0_i32_1 = arith.constant 0 : i32
    return %c0_i32, %c0_i32_0 : i32, i32
  }
  func.func @transform_2(%arg0: i32, %arg1: i32) -> (i32, i32) {
    %c0_i32 = arith.constant 0 : i32
    %c0_i32_0 = arith.constant 0 : i32
    %c0_i32_1 = arith.constant 0 : i32
    return %c0_i32, %c0_i32_0 : i32, i32
  }
  func.func @transform_3(%arg0: i32, %arg1: i32) -> (i32, i32) {
    %c0_i32 = arith.constant 0 : i32
    %c0_i32_0 = arith.constant 0 : i32
    %c0_i32_1 = arith.constant 0 : i32
    return %c0_i32, %c0_i32_0 : i32, i32
  }
  func.func @transform_4(%arg0: i32, %arg1: i32) -> (i32, i32) {
    %c0_i32 = arith.constant 0 : i32
    %c0_i32_0 = arith.constant 0 : i32
    %c0_i32_1 = arith.constant 0 : i32
    return %c0_i32, %c0_i32_0 : i32, i32
  }
  func.func @transform_5(%arg0: i32, %arg1: i32) -> (i32, i32, i32) {
    %c0_i32 = arith.constant 0 : i32
    %c0_i32_0 = arith.constant 0 : i32
    %c0_i32_1 = arith.constant 0 : i32
    return %arg0, %c0_i32, %c0_i32_0 : i32, i32, i32
  }
}

</mosaic_0001>

<bundles_post_ra>
// kernel: tpu_custom_call.1
= control target key start
LH: loop header
LB: loop body
LE: loop exit
PB: predicated region body
PF: predicated region fallthrough
CT: control target
= control target key end

     0   :  { %10 = vsyncpa [#allocation5], 0  ;;  %s8662_s0 = inlined_call_operand.hbm [shape: f32[2,128,256], index: 0, kind: input, shape index: {}]   ;;  %s8663_s1 = inlined_call_operand.vmem [shape: f32[128,1], index: 1, kind: input, shape index: {}]   ;;  %s8664_s2 = inlined_call_operand.vmem [shape: f32[128,1], index: 2, kind: input, shape index: {}]   ;;  %s8665_s3 = inlined_call_operand.vmem [shape: f32[128,32], index: 3, kind: input, shape index: {}]   ;;  %s8666_s4 = inlined_call_operand.vmem [shape: f32[32,128], index: 4, kind: input, shape index: {}]   ;;  %s8667_s5 = inlined_call_operand.vmem [shape: f32[2,128,2], index: 5, kind: output, shape index: {}]  }
   0x1   :  { %12 = vsyncpa [#allocation5 + $0x1], 0  ;;  %s6911_s18 = smov 0   ;;  %s6913_s19 = smov 0  }
   0x2   :  { %s6915_s20 = smov 0   ;;  %s6917_s21 = smov 0  }
   0x3   :  { %s6919_s22 = smov 0   ;;  %s6921_s23 = smov 0  }
   0x4   :  { %s6923_s24 = smov 0   ;;  %s6925_s25 = smov 0  }
   0x5 LB: > { %s4677_s26 = sadd.s32 4294967295, %s6873_s25   ;;  %s27_s27 = sadd.s32 1, %s6865_s23  ;;  %s6873_s25 = sphi %s6925_s25, %s18_s25   ;;  %s6869_s24 = sphi %s6923_s24, %s8957_s24   ;;  %s6865_s23 = sphi %s6921_s23, %s8956_s23   ;;  %s6861_s22 = sphi %s6919_s22, %s8955_s22   ;;  %s6857_s21 = sphi %s6917_s21, %s8954_s21   ;;  %s6853_s20 = sphi %s6915_s20, %s8953_s20   ;;  %s6849_s19 = sphi %s6913_s19, %s8952_s19   ;;  %s6845_s18 = sphi %s6911_s18, %s8951_s18  }
   0x6   : > { %p28_p0 = scmp.ge.s32.totalorder %s27_s27, 2  ;;  %s30_s28 = sadd.s32 1, %s6869_s24 }
   0x7   : > { %s39_s29 = sadd.s32 1, %s6853_s20  ;;  %p46_p1 = scmp.ne.s32.totalorder %s6853_s20, %s6849_s19 }
   0x8   : > { %s8959_s27 = smov (%p28_p0, %s27_s27), 0  ;;  %s8961_s28 = smov (!%p28_p0, %s30_s28), %s6869_s24 }
   0x9   : > { %8796 = sst [smem:[#allocation7_spill]] %s8959_s27  ;;  %s35_s30 = ssub.s32 %s6865_s23, %s8959_s27 }
   0xa   : > { %p47_p2 = scmp.eq.s32.totalorder %s6873_s25, 0  ;;  %p32_p3 = scmp.ge.s32.totalorder %s8961_s28, 2 }
   0xb   : > { %p52_p4 = scmp.ne.s32.totalorder %s6849_s19, %s6845_s18  ;;  %p53_p6 = scmp.eq.s32.totalorder %s4677_s26, 0 }
   0xc   : > { %p6962_p5 = por %p47_p2, %p46_p1  ;;  %s8963_s28 = smov (%p32_p3, %s8961_s28), 0 }
   0xd   : > { %p6968_p7 = por %p53_p6, %p52_p4  ;;  %s34_s8 = ssub.s32 %s6869_s24, %s8963_s28 }
   0xe   : > { %p6699_p8 = scmp.lt.s32.totalorder %s6873_s25, 4  ;;  %s36_s9 = sor.u32 %s35_s30, %s34_s8 }
   0xf   : > { %s198_s10 = sand.u32 1, %s6853_s20   ;;  %p37_p9 = scmp.eq.s32.totalorder %s36_s9, 0 }
  0x10   : > { %s4681_s11 = sshll.u32 %s198_s10, 7  ;;  %s4682_s12 = sshll.u32 %s6869_s24, 5 }
  0x11   : > { %s6978_s13 = scalar_select %p37_p9, %s6853_s20, %s39_s29  }
  0x12   : > { %s207_s14 = sadd.s32 %s6865_s23, %s4682_s12  ;;  %s202_s16 = scalar_lea.vmem [#allocation4], %s4681_s11 }
  0x13   : > { %s4683_s15 = sshll.u32 %s207_s14, 7  ;;  %s210_s17 = sshll.u32 %s202_s16, 4  ;;  %s6986_s17 = int_to_ptr.vmem [resolvable:$true] %s210_s17 }
  0x14   : > { %s6984_s27 = scalar_lea.hbm %s8662_s0, %s4683_s15  ;;  %p6992_p10 = pnand %p6699_p8, %p6962_p5 }
  0x15   : > { %s6997_s30 = scalar_lea.sflag [#allocation5], %s198_s10  ;;  %s6777_s8 = scalar_lea.hbm %s6984_s27, 2048 }
  0x16   : > { %p6778_p12 = scmp.ne.s32.totalorder %s6984_s27, %s6777_s8  ;;  %p6779_p13 = pneg %p6992_p10 }
  0x17   : > { %s6782_s11 = scalar_lea.hbm %s8662_s0, 8192  ;;  %p6783_p2 = scmp.lt.u32.totalorder %s6984_s27, %s8662_s0 }
  0x18   : > { %p6780_p0 = pnand %p6779_p13, %p6778_p12  ;;  %p6784_p3 = scmp.lt.u32.totalorder %s6782_s11, %s6777_s8 }
  0x19   : > { %p6786_p5 = scmp.lt.u32.totalorder %s6777_s8, %s6984_s27 }
  0x1a   : > { %p6781_p1 = pneg %p6780_p0  ;;  %p6785_p4 = por %p6784_p3, %p6783_p2 }
  0x1c   : > { %p6787_p6 = por %p6786_p5, %p6785_p4 }
  0x1e   : > { %p6788_p8 = pnand %p6787_p6, %p6781_p1 }
  0x20   : > { %6791 = shalt.err (!%p6788_p8)
}
  0x21   : > { %s6792_s10 = scalar_lea.vmem %s6986_s17, 2048  ;;  %s6875_s15 = smov [#allocation4]  }
  0x22   : > { %p6793_p9 = scmp.ne.s32.totalorder %s6986_s17, %s6792_s10  ;;  %s6797_s16 = sshll.u32 %s6875_s15, 4  ;;  %s6798_s16 = int_to_ptr.vmem [resolvable:$false] %s6797_s16 }
  0x23   : > { %s6799_s18 = scalar_lea.vmem %s6798_s16, 4096  ;;  %p6800_p11 = scmp.lt.s32.totalorder %s6986_s17, %s6798_s16 }
  0x24   : > { %p6795_p12 = pnand %p6793_p9, %p6779_p13  ;;  %p6801_p2 = scmp.lt.s32.totalorder %s6799_s18, %s6792_s10 }
  0x26   : > { %p6796_p0 = pneg %p6795_p12  ;;  %p6802_p3 = por %p6801_p2, %p6800_p11 }
  0x28   : > { %p6803_p4 = pnand %p6802_p3, %p6796_p0 }
  0x2a   : > { %6806 = shalt.err (!%p6803_p4)
}
  0x2b   : > { %s6876_s26 = smov 256   ;;  %s6877_s8 = smov 128  }
  0x2c   : > { %s6878_s9 = smov 8   ;;  %p218_p13 = scmp.lt.s32.totalorder %s6873_s25, 5 }
  0x2d   : > { %6698 = dma.hbm_to_vmem [thread:$0]  (!%p6992_p10), %s6984_s27, 2048, %s6986_s17, %s6997_s30, %s6876_s26, %s6877_s8, %s6878_s9  }
  0x2e   : > { %p8800_p1 = scmp.ge.s32.totalorder %s6873_s25, 1 }
  0x30   : > { %p219_p5 = pnand %p8800_p1, %p218_p13 }
  0x31   : > { %s224_s6 = sand.u32 (!%p219_p5), 1, %s6849_s19  }
  0x32   : > { %222 = sbr.rel (%p219_p5) target bundleno = 1254 (0x4e6), region = 40  ;;  %s4685_s11 = sshll.u32 (!%p219_p5), %s224_s6, 7 }
  0x33   : > { %s225_s12 = scalar_lea.sflag (!%p219_p5), [#allocation5], %s224_s6  ;;  %s7029_s14 = scalar_lea.vmem (!%p219_p5), [#allocation4], %s4685_s11 }
  0x39   : > { %6840 = dma.done.wait (%p6968_p7), %s225_s12, 2048  }
  0x3a   : > { %6842 = vsyncadd (%p6968_p7), %s225_s12, 4294965248  ;;  %p255_p11 = scmp.lt.s32.totalorder %s6861_s22, 1  ;;  %p4688_p10 = scmp.ne.s32.totalorder %s6857_s21, 0 }
  0x3b   : > { %vm264_vm0 = vcmask (!%p4688_p10), 7168   ;;  %v6879_v0 = vmov (!%p4688_p10), 0.0  }
  0x3c   : > { %s8965_s22 = smov (!%p255_p11, %s6861_s22), 1  ;;  %263 = sbr.rel (%p4688_p10) target bundleno = 77 (0x4d), region = 48 }
  0x3d   : > { %s4692_s27 = sshll.u32 %s8965_s22, 7  ;;  %265 = vst.msk [vmem:[#allocation2] sm:$0xff] (!%p4688_p10), %vm264_vm0, %v6879_v0  ;;  %266 = vst.msk [vmem:[#allocation2 + $0x8] sm:$0xff] (!%p4688_p10), %vm264_vm0, %v6879_v0 }
  0x3e   : > { %s7040_s30 = scalar_lea.vmem %s8667_s5, %s4692_s27  ;;  %267 = vst.msk [vmem:[#allocation2 + $0x10] sm:$0xff] (!%p4688_p10), %vm264_vm0, %v6879_v0  ;;  %268 = vst.msk [vmem:[#allocation2 + $0x18] sm:$0xff] (!%p4688_p10), %vm264_vm0, %v6879_v0 }
  0x3f   : > { %269 = vst.msk [vmem:[#allocation2 + $0x20] sm:$0xff] (!%p4688_p10), %vm264_vm0, %v6879_v0  ;;  %270 = vst.msk [vmem:[#allocation2 + $0x28] sm:$0xff] (!%p4688_p10), %vm264_vm0, %v6879_v0 }
  0x40   : > { %271 = vst.msk [vmem:[#allocation2 + $0x30] sm:$0xff] (!%p4688_p10), %vm264_vm0, %v6879_v0  ;;  %272 = vst.msk [vmem:[#allocation2 + $0x38] sm:$0xff] (!%p4688_p10), %vm264_vm0, %v6879_v0 }
  0x41   : > { %273 = vst.msk [vmem:[#allocation2 + $0x40] sm:$0xff] (!%p4688_p10), %vm264_vm0, %v6879_v0  ;;  %274 = vst.msk [vmem:[#allocation2 + $0x48] sm:$0xff] (!%p4688_p10), %vm264_vm0, %v6879_v0 }
  0x42   : > { %275 = vst.msk [vmem:[#allocation2 + $0x50] sm:$0xff] (!%p4688_p10), %vm264_vm0, %v6879_v0  ;;  %276 = vst.msk [vmem:[#allocation2 + $0x58] sm:$0xff] (!%p4688_p10), %vm264_vm0, %v6879_v0 }
  0x43   : > { %277 = vst.msk [vmem:[#allocation2 + $0x60] sm:$0xff] %vm264_vm0, %v6879_v0  ;;  %278 = vst.msk [vmem:[#allocation2 + $0x68] sm:$0xff] %vm264_vm0, %v6879_v0 }
  0x44   : > { %279 = vst.msk [vmem:[#allocation2 + $0x70] sm:$0xff] %vm264_vm0, %v6879_v0  ;;  %280 = vst.msk [vmem:[#allocation2 + $0x78] sm:$0xff] %vm264_vm0, %v6879_v0 }
  0x45   : > { %281 = vst.msk [vmem:[#allocation3] sm:$0xff] %vm264_vm0, %v6879_v0  ;;  %282 = vst.msk [vmem:[#allocation3 + $0x8] sm:$0xff] %vm264_vm0, %v6879_v0 }
  0x46   : > { %283 = vst.msk [vmem:[#allocation3 + $0x10] sm:$0xff] %vm264_vm0, %v6879_v0  ;;  %284 = vst.msk [vmem:[#allocation3 + $0x18] sm:$0xff] %vm264_vm0, %v6879_v0 }
  0x47   : > { %285 = vst.msk [vmem:[#allocation3 + $0x20] sm:$0xff] %vm264_vm0, %v6879_v0  ;;  %286 = vst.msk [vmem:[#allocation3 + $0x28] sm:$0xff] %vm264_vm0, %v6879_v0 }
  0x48   : > { %287 = vst.msk [vmem:[#allocation3 + $0x30] sm:$0xff] %vm264_vm0, %v6879_v0  ;;  %288 = vst.msk [vmem:[#allocation3 + $0x38] sm:$0xff] %vm264_vm0, %v6879_v0 }
  0x49   : > { %289 = vst.msk [vmem:[#allocation3 + $0x40] sm:$0xff] %vm264_vm0, %v6879_v0  ;;  %290 = vst.msk [vmem:[#allocation3 + $0x48] sm:$0xff] %vm264_vm0, %v6879_v0 }
  0x4a   : > { %291 = vst.msk [vmem:[#allocation3 + $0x50] sm:$0xff] %vm264_vm0, %v6879_v0  ;;  %292 = vst.msk [vmem:[#allocation3 + $0x58] sm:$0xff] %vm264_vm0, %v6879_v0 }
  0x4b   : > { %293 = vst.msk [vmem:[#allocation3 + $0x60] sm:$0xff] %vm264_vm0, %v6879_v0  ;;  %294 = vst.msk [vmem:[#allocation3 + $0x68] sm:$0xff] %vm264_vm0, %v6879_v0 }
  0x4c   : > { %295 = vst.msk [vmem:[#allocation3 + $0x70] sm:$0xff] %vm264_vm0, %v6879_v0  ;;  %296 = vst.msk [vmem:[#allocation3 + $0x78] sm:$0xff] %vm264_vm0, %v6879_v0 }
  0x4d PF: > { %v299_v1 = vld [vmem:[%s7029_s14 + $0x10] sm:$0xff]  ;;  %v297_v2 = vld [vmem:[%s7029_s14] sm:$0xff]  ;;  %v300_v3 = vld [vmem:[%s7029_s14 + $0x18] sm:$0xff]  ;;  %vm377_vm1 = vcmask 7168   ;;  %p4689_p7 = scmp.ne.s32.totalorder %s6857_s21, 1 }
  0x4e   : > { %333 = vadd.xlane.f32.xlu1 %v299_v1  ;;  %329 = vadd.xlane.f32.xlu0 %v297_v2  ;;  %v298_v4 = vld [vmem:[%s7029_s14 + $0x8] sm:$0xff]  ;;  %v301_v6 = vld [vmem:[%s7029_s14 + $0x20] sm:$0xff]  ;;  %v304_v7 = vld [vmem:[%s7029_s14 + $0x38] sm:$0xff]  ;;  %v410_v18 = vmul.f32 %v297_v2, %v297_v2  ;;  %v413_v19 = vmul.f32 %v300_v3, %v300_v3  ;;  %v412_v20 = vmul.f32 %v299_v1, %v299_v1 }
  0x4f   : > { %v302_v5 = vld [vmem:[%s7029_s14 + $0x28] sm:$0xff]  ;;  %v303_v8 = vld [vmem:[%s7029_s14 + $0x30] sm:$0xff]  ;;  %v305_v10 = vld [vmem:[%s7029_s14 + $0x40] sm:$0xff]  ;;  %v411_v17 = vmul.f32 %v298_v4, %v298_v4  ;;  %v414_v22 = vmul.f32 %v301_v6, %v301_v6  ;;  %v417_v23 = vmul.f32 %v304_v7, %v304_v7 }
  0x50   : > { %v306_v9 = vld [vmem:[%s7029_s14 + $0x48] sm:$0xff]  ;;  %v308_v11 = vld [vmem:[%s7029_s14 + $0x58] sm:$0xff]  ;;  %v307_v12 = vld [vmem:[%s7029_s14 + $0x50] sm:$0xff]  ;;  %v415_v21 = vmul.f32 %v302_v5, %v302_v5  ;;  %v416_v24 = vmul.f32 %v303_v8, %v303_v8  ;;  %v418_v26 = vmul.f32 %v305_v10, %v305_v10 }
  0x51   : > { %v310_v13 = vld [vmem:[%s7029_s14 + $0x68] sm:$0xff]  ;;  %v309_v14 = vld [vmem:[%s7029_s14 + $0x60] sm:$0xff]  ;;  %v312_v15 = vld [vmem:[%s7029_s14 + $0x78] sm:$0xff]  ;;  %v419_v25 = vmul.f32 %v306_v9, %v306_v9  ;;  %v421_v27 = vmul.f32 %v308_v11, %v308_v11  ;;  %v420_v28 = vmul.f32 %v307_v12, %v307_v12 }
  0x52   : > { %335 = vadd.xlane.f32.xlu1 %v300_v3  ;;  %331 = vadd.xlane.f32.xlu0 %v298_v4  ;;  %v311_v16 = vld [vmem:[%s7029_s14 + $0x70] sm:$0xff]  ;;  %v423_v29 = vmul.f32 %v310_v13, %v310_v13  ;;  %v422_v30 = vmul.f32 %v309_v14, %v309_v14  ;;  %v425_v31 = vmul.f32 %v312_v15, %v312_v15  ;;  %v313_v34 = vld [vmem:[#allocation2] sm:$0xff]  ;;  %v316_v39 = vld [vmem:[#allocation2 + $0x18] sm:$0xff] }
  0x53   : > { %v424_v32 = vmul.f32 %v311_v16, %v311_v16  ;;  %v315_v33 = vld [vmem:[#allocation2 + $0x10] sm:$0xff]  ;;  %v314_v40 = vld [vmem:[#allocation2 + $0x8] sm:$0xff]  ;;  %v317_v46 = vld [vmem:[#allocation2 + $0x20] sm:$0xff] }
  0x54   : > { %v318_v45 = vld [vmem:[#allocation2 + $0x28] sm:$0xff]  ;;  %v320_v51 = vld [vmem:[#allocation2 + $0x38] sm:$0xff]  ;;  %v319_v52 = vld [vmem:[#allocation2 + $0x30] sm:$0xff] }
  0x55   : > { %v322_v57 = vld [vmem:[#allocation2 + $0x48] sm:$0xff]  ;;  %v321_v58 = vld [vmem:[#allocation2 + $0x40] sm:$0xff]  ;;  %v324_v63 = vld [vmem:[#allocation2 + $0x58] sm:$0xff] }
  0x56   : > { %339 = vadd.xlane.f32.xlu1 %v302_v5  ;;  %337 = vadd.xlane.f32.xlu0 %v301_v6  ;;  %v323_v0 = vld [vmem:[#allocation2 + $0x50] sm:$0xff]  ;;  %v326_v5 = vld [vmem:[#allocation2 + $0x68] sm:$0xff]  ;;  %v325_v6 = vld [vmem:[#allocation2 + $0x60] sm:$0xff] }
  0x5a   : > { %343 = vadd.xlane.f32.xlu1 %v304_v7  ;;  %341 = vadd.xlane.f32.xlu0 %v303_v8 }
  0x5e   : > { %347 = vadd.xlane.f32.xlu1 %v306_v9  ;;  %345 = vadd.xlane.f32.xlu0 %v305_v10 }
  0x62   : > { %351 = vadd.xlane.f32.xlu1 %v308_v11  ;;  %349 = vadd.xlane.f32.xlu0 %v307_v12  ;;  %v328_v11 = vld [vmem:[#allocation2 + $0x78] sm:$0xff]  ;;  %v327_v12 = vld [vmem:[#allocation2 + $0x70] sm:$0xff] }
  0x66   : > { %355 = vadd.xlane.f32.xlu1 %v310_v13  ;;  %353 = vadd.xlane.f32.xlu0 %v309_v14 }
  0x6a   : > { %359 = vadd.xlane.f32.xlu1 %v312_v15  ;;  %357 = vadd.xlane.f32.xlu0 %v311_v16 }
  0x6e   : > { %428 = vadd.xlane.f32.xlu1 %v411_v17  ;;  %426 = vadd.xlane.f32.xlu0 %v410_v18  ;;  %v395_v17 = vld [vmem:[#allocation3 + $0x8] sm:$0xff]  ;;  %v394_v18 = vld [vmem:[#allocation3] sm:$0xff] }
  0x72   : > { %432 = vadd.xlane.f32.xlu1 %v413_v19  ;;  %430 = vadd.xlane.f32.xlu0 %v412_v20 }
  0x76   : > { %436 = vadd.xlane.f32.xlu1 %v415_v21  ;;  %434 = vadd.xlane.f32.xlu0 %v414_v22 }
  0x7a   : > { %440 = vadd.xlane.f32.xlu1 %v417_v23  ;;  %438 = vadd.xlane.f32.xlu0 %v416_v24  ;;  %v397_v23 = vld [vmem:[#allocation3 + $0x18] sm:$0xff]  ;;  %v396_v24 = vld [vmem:[#allocation3 + $0x10] sm:$0xff] }
  0x7e   : > { %444 = vadd.xlane.f32.xlu1 %v419_v25  ;;  %442 = vadd.xlane.f32.xlu0 %v418_v26 }
  0x82   : > { %448 = vadd.xlane.f32.xlu1 %v421_v27  ;;  %446 = vadd.xlane.f32.xlu0 %v420_v28 }
  0x86   : > { %452 = vadd.xlane.f32.xlu1 %v423_v29  ;;  %450 = vadd.xlane.f32.xlu0 %v422_v30  ;;  %v399_v29 = vld [vmem:[#allocation3 + $0x28] sm:$0xff]  ;;  %v398_v30 = vld [vmem:[#allocation3 + $0x20] sm:$0xff] }
  0x8a   : > { %456 = vadd.xlane.f32.xlu1 %v425_v31  ;;  %454 = vadd.xlane.f32.xlu0 %v424_v32 }
  0xdb   : > { %v334_v35 = vpop.xlane.xlu1 %333  ;;  %v330_v36 = vpop.xlane.xlu0 %329 }
  0xdc   : > { %v363_v37 = vadd.f32 %v334_v35, %v315_v33  ;;  %v361_v38 = vadd.f32 %v330_v36, %v313_v34  ;;  %v401_v35 = vld [vmem:[#allocation3 + $0x38] sm:$0xff]  ;;  %v400_v36 = vld [vmem:[#allocation3 + $0x30] sm:$0xff] }
  0xde   : > { %380 = vst.msk [vmem:[#allocation2 + $0x10] sm:$0xff] %vm377_vm1, %v363_v37  ;;  %378 = vst.msk [vmem:[#allocation2] sm:$0xff] %vm377_vm1, %v361_v38 }
  0xdf   : > { %v336_v41 = vpop.xlane.xlu1 %335  ;;  %v332_v42 = vpop.xlane.xlu0 %331 }
  0xe0   : > { %v364_v43 = vadd.f32 %v336_v41, %v316_v39  ;;  %v362_v44 = vadd.f32 %v332_v42, %v314_v40  ;;  %v403_v41 = vld [vmem:[#allocation3 + $0x48] sm:$0xff]  ;;  %v402_v42 = vld [vmem:[#allocation3 + $0x40] sm:$0xff] }
  0xe2   : > { %381 = vst.msk [vmem:[#allocation2 + $0x18] sm:$0xff] %vm377_vm1, %v364_v43  ;;  %379 = vst.msk [vmem:[#allocation2 + $0x8] sm:$0xff] %vm377_vm1, %v362_v44 }
  0xe3   : > { %v340_v47 = vpop.xlane.xlu1 %339  ;;  %v338_v48 = vpop.xlane.xlu0 %337 }
  0xe4   : > { %v366_v49 = vadd.f32 %v340_v47, %v318_v45  ;;  %v365_v50 = vadd.f32 %v338_v48, %v317_v46  ;;  %v405_v47 = vld [vmem:[#allocation3 + $0x58] sm:$0xff]  ;;  %v404_v48 = vld [vmem:[#allocation3 + $0x50] sm:$0xff] }
  0xe6   : > { %383 = vst.msk [vmem:[#allocation2 + $0x28] sm:$0xff] %vm377_vm1, %v366_v49  ;;  %382 = vst.msk [vmem:[#allocation2 + $0x20] sm:$0xff] %vm377_vm1, %v365_v50 }
  0xe7   : > { %v344_v53 = vpop.xlane.xlu1 %343  ;;  %v342_v54 = vpop.xlane.xlu0 %341 }
  0xe8   : > { %v368_v55 = vadd.f32 %v344_v53, %v320_v51  ;;  %v367_v56 = vadd.f32 %v342_v54, %v319_v52  ;;  %v407_v53 = vld [vmem:[#allocation3 + $0x68] sm:$0xff]  ;;  %v406_v54 = vld [vmem:[#allocation3 + $0x60] sm:$0xff] }
  0xea   : > { %385 = vst.msk [vmem:[#allocation2 + $0x38] sm:$0xff] %vm377_vm1, %v368_v55  ;;  %384 = vst.msk [vmem:[#allocation2 + $0x30] sm:$0xff] %vm377_vm1, %v367_v56 }
  0xeb   : > { %v348_v59 = vpop.xlane.xlu1 %347  ;;  %v346_v60 = vpop.xlane.xlu0 %345 }
  0xec   : > { %v370_v61 = vadd.f32 %v348_v59, %v322_v57  ;;  %v369_v62 = vadd.f32 %v346_v60, %v321_v58  ;;  %v409_v59 = vld [vmem:[#allocation3 + $0x78] sm:$0xff]  ;;  %v408_v60 = vld [vmem:[#allocation3 + $0x70] sm:$0xff] }
  0xee   : > { %387 = vst.msk [vmem:[#allocation2 + $0x48] sm:$0xff] %vm377_vm1, %v370_v61  ;;  %386 = vst.msk [vmem:[#allocation2 + $0x40] sm:$0xff] %vm377_vm1, %v369_v62 }
  0xef   : > { %v352_v1 = vpop.xlane.xlu1 %351  ;;  %v350_v2 = vpop.xlane.xlu0 %349 }
  0xf0   : > { %v372_v3 = vadd.f32 %v352_v1, %v324_v63  ;;  %v371_v4 = vadd.f32 %v350_v2, %v323_v0 }
  0xf2   : > { %389 = vst.msk [vmem:[#allocation2 + $0x58] sm:$0xff] %vm377_vm1, %v372_v3  ;;  %388 = vst.msk [vmem:[#allocation2 + $0x50] sm:$0xff] %vm377_vm1, %v371_v4 }
  0xf3   : > { %v356_v7 = vpop.xlane.xlu1 %355  ;;  %v354_v8 = vpop.xlane.xlu0 %353 }
  0xf4   : > { %v374_v9 = vadd.f32 %v356_v7, %v326_v5  ;;  %v373_v10 = vadd.f32 %v354_v8, %v325_v6 }
  0xf6   : > { %391 = vst.msk [vmem:[#allocation2 + $0x68] sm:$0xff] %vm377_vm1, %v374_v9  ;;  %390 = vst.msk [vmem:[#allocation2 + $0x60] sm:$0xff] %vm377_vm1, %v373_v10 }
  0xf7   : > { %v360_v13 = vpop.xlane.xlu1 %359  ;;  %v358_v14 = vpop.xlane.xlu0 %357 }
  0xf8   : > { %v376_v15 = vadd.f32 %v360_v13, %v328_v11  ;;  %v375_v16 = vadd.f32 %v358_v14, %v327_v12 }
  0xfa   : > { %393 = vst.msk [vmem:[#allocation2 + $0x78] sm:$0xff] %vm377_vm1, %v376_v15  ;;  %392 = vst.msk [vmem:[#allocation2 + $0x70] sm:$0xff] %vm377_vm1, %v375_v16 }
  0xfb   : > { %v429_v19 = vpop.xlane.xlu1 %428  ;;  %v427_v20 = vpop.xlane.xlu0 %426 }
  0xfc   : > { %v459_v21 = vadd.f32 %v429_v19, %v395_v17  ;;  %v458_v22 = vadd.f32 %v427_v20, %v394_v18 }
  0xfe   : > { %475 = vst.msk [vmem:[#allocation3 + $0x8] sm:$0xff] %vm377_vm1, %v459_v21  ;;  %474 = vst.msk [vmem:[#allocation3] sm:$0xff] %vm377_vm1, %v458_v22 }
  0xff   : > { %v433_v25 = vpop.xlane.xlu1 %432  ;;  %v431_v26 = vpop.xlane.xlu0 %430 }
 0x100   : > { %v461_v27 = vadd.f32 %v433_v25, %v397_v23  ;;  %v460_v28 = vadd.f32 %v431_v26, %v396_v24 }
 0x102   : > { %477 = vst.msk [vmem:[#allocation3 + $0x18] sm:$0xff] %vm377_vm1, %v461_v27  ;;  %476 = vst.msk [vmem:[#allocation3 + $0x10] sm:$0xff] %vm377_vm1, %v460_v28 }
 0x103   : > { %v437_v31 = vpop.xlane.xlu1 %436  ;;  %v435_v32 = vpop.xlane.xlu0 %434 }
 0x104   : > { %v463_v33 = vadd.f32 %v437_v31, %v399_v29  ;;  %v462_v34 = vadd.f32 %v435_v32, %v398_v30 }
 0x106   : > { %479 = vst.msk [vmem:[#allocation3 + $0x28] sm:$0xff] %vm377_vm1, %v463_v33  ;;  %478 = vst.msk [vmem:[#allocation3 + $0x20] sm:$0xff] %vm377_vm1, %v462_v34 }
 0x107   : > { %v441_v37 = vpop.xlane.xlu1 %440  ;;  %v439_v38 = vpop.xlane.xlu0 %438 }
 0x108   : > { %v465_v39 = vadd.f32 %v441_v37, %v401_v35  ;;  %v464_v40 = vadd.f32 %v439_v38, %v400_v36 }
 0x10a   : > { %481 = vst.msk [vmem:[#allocation3 + $0x38] sm:$0xff] %vm377_vm1, %v465_v39  ;;  %480 = vst.msk [vmem:[#allocation3 + $0x30] sm:$0xff] %vm377_vm1, %v464_v40 }
 0x10b   : > { %v445_v43 = vpop.xlane.xlu1 %444  ;;  %v443_v44 = vpop.xlane.xlu0 %442 }
 0x10c   : > { %v467_v45 = vadd.f32 %v445_v43, %v403_v41  ;;  %v466_v46 = vadd.f32 %v443_v44, %v402_v42 }
 0x10e   : > { %483 = vst.msk [vmem:[#allocation3 + $0x48] sm:$0xff] %vm377_vm1, %v467_v45  ;;  %482 = vst.msk [vmem:[#allocation3 + $0x40] sm:$0xff] %vm377_vm1, %v466_v46 }
 0x10f   : > { %v449_v49 = vpop.xlane.xlu1 %448  ;;  %v447_v50 = vpop.xlane.xlu0 %446 }
 0x110   : > { %v469_v51 = vadd.f32 %v449_v49, %v405_v47  ;;  %v468_v52 = vadd.f32 %v447_v50, %v404_v48 }
 0x112   : > { %485 = vst.msk [vmem:[#allocation3 + $0x58] sm:$0xff] %vm377_vm1, %v469_v51  ;;  %484 = vst.msk [vmem:[#allocation3 + $0x50] sm:$0xff] %vm377_vm1, %v468_v52 }
 0x113   : > { %v453_v55 = vpop.xlane.xlu1 %452  ;;  %v451_v56 = vpop.xlane.xlu0 %450 }
 0x114   : > { %v471_v57 = vadd.f32 %v453_v55, %v407_v53  ;;  %v470_v58 = vadd.f32 %v451_v56, %v406_v54  ;;  %493 = sbr.rel (%p4689_p7) target bundleno = 1254 (0x4e6), region = 52 }
 0x116   : > { %487 = vst.msk [vmem:[#allocation3 + $0x68] sm:$0xff] %vm377_vm1, %v471_v57  ;;  %486 = vst.msk [vmem:[#allocation3 + $0x60] sm:$0xff] %vm377_vm1, %v470_v58 }
 0x117   : > { %v457_v61 = vpop.xlane.xlu1 %456  ;;  %v455_v62 = vpop.xlane.xlu0 %454 }
 0x118   : > { %v473_v63 = vadd.f32 %v457_v61, %v409_v59  ;;  %v472_v0 = vadd.f32 %v455_v62, %v408_v60 }
 0x11a   : > { %489 = vst.msk [vmem:[#allocation3 + $0x78] sm:$0xff] %vm377_vm1, %v473_v63  ;;  %488 = vst.msk [vmem:[#allocation3 + $0x70] sm:$0xff] %vm377_vm1, %v472_v0 }
 0x11b   : > { %v7124_v1 = vld [vmem:[#allocation2] sm:$0xff]  ;;  %v7126_v2 = vld [vmem:[#allocation2 + $0x8] sm:$0xff]  ;;  %v7135_v8 = vld [vmem:[#allocation2 + $0x10] sm:$0xff]  ;;  %vm2111_vm2 = vcmask 261120   ;;  %s6880_s16 = smov 1   ;;  %vm4580_vm3 = vcmask 15368  }
 0x11c   : > { %v7128_v3 = vld [vmem:[#allocation3] sm:$0xff]  ;;  %v531_v4 = vand.u32 4294901760, %v7124_v1  ;;  %v534_v5 = vand.u32 4294901760, %v7126_v2  ;;  %v7132_v6 = vld [vmem:[#allocation3 + $0x8] sm:$0xff]  ;;  %v7137_v9 = vld [vmem:[#allocation2 + $0x18] sm:$0xff]  ;;  %v537_v11 = vand.u32 4294901760, %v7135_v8 }
 0x11d   : > { %v1317_v7 = vand.u32 4294901760, %v7128_v3  ;;  %v1320_v10 = vand.u32 4294901760, %v7132_v6  ;;  %v540_v12 = vand.u32 4294901760, %v7137_v9  ;;  %v7142_v13 = vld [vmem:[#allocation3 + $0x10] sm:$0xff]  ;;  %v7144_v14 = vld [vmem:[#allocation3 + $0x18] sm:$0xff]  ;;  %v7146_v15 = vld [vmem:[#allocation2 + $0x20] sm:$0xff] }
 0x11e   : > { %v7152_v16 = vpack.c.bf16 %v534_v5, %v531_v4  ;;  %v8688_v17 = vand.u32 4294901760, %v7142_v13  ;;  %v8687_v18 = vand.u32 4294901760, %v7144_v14  ;;  %v7156_v19 = vld [vmem:[#allocation2 + $0x28] sm:$0xff]  ;;  %v8686_v20 = vand.u32 4294901760, %v7146_v15  ;;  %v7159_v21 = vld [vmem:[#allocation3 + $0x20] sm:$0xff]  ;;  %v7177_v27 = vld [vmem:[#allocation2 + $0x30] sm:$0xff] }
 0x11f   : > { %v7161_v22 = vld [vmem:[#allocation3 + $0x28] sm:$0xff]  ;;  %v7167_v23 = vpack.c.bf16 %v1320_v10, %v1317_v7  ;;  %v7173_v24 = vpack.c.bf16 %v540_v12, %v537_v11  ;;  %v8683_v25 = vand.u32 4294901760, %v7156_v19  ;;  %v8680_v26 = vand.u32 4294901760, %v7159_v21  ;;  %v7179_v28 = vld [vmem:[#allocation2 + $0x38] sm:$0xff]  ;;  %v7181_v29 = vld [vmem:[#allocation3 + $0x30] sm:$0xff] }
 0x120   : > { %6014 = vmatprep.subr.bf16.mxu0 %v7152_v16  ;;  %v7188_v30 = vpack.c.bf16 %v8687_v18, %v8688_v17  ;;  %v8669_v31 = vand.u32 4294901760, %v7161_v22  ;;  %v8675_v32 = vand.u32 4294901760, %v7177_v27  ;;  %v7192_v33 = vld [vmem:[#allocation3 + $0x38] sm:$0xff]  ;;  %v7194_v34 = vld [vmem:[#allocation2 + $0x40] sm:$0xff]  ;;  %v7196_v35 = vld [vmem:[#allocation2 + $0x48] sm:$0xff]  ;;  %v8672_v36 = vand.u32 4294901760, %v7179_v28 }
 0x121   : > { %8801 = vst [vmem:[#allocation8_spill] sm:$0xff] %v7167_v23  ;;  %8802 = vst [vmem:[#allocation9_spill] sm:$0xff] %v7173_v24  ;;  %6206 = vmatprep.subr.bf16.mxu1 %v7167_v23  ;;  %6016 = vmatpush3.bf16.msra.mxu0 %v7152_v16  ;;  %v8671_v37 = vand.u32 4294901760, %v7181_v29  ;;  %v8670_v38 = vand.u32 4294901760, %v7192_v33  ;;  %v7203_v39 = vld [vmem:[#allocation3 + $0x40] sm:$0xff]  ;;  %v7205_v40 = vld [vmem:[#allocation3 + $0x48] sm:$0xff]  ;;  %v7215_v42 = vpack.c.bf16 %v8683_v25, %v8686_v20 }
 0x122   : > { %8803 = vst [vmem:[#allocation10_spill] sm:$0xff] %v7188_v30  ;;  %v7207_v41 = vld [vmem:[#allocation2 + $0x50] sm:$0xff]  ;;  %6208 = vmatpush3.bf16.msra.mxu1 %v7167_v23  ;;  %6018 = vmatprep.subr.bf16.mxu0 %v7173_v24  ;;  %v8674_v43 = vand.u32 4294901760, %v7194_v34  ;;  %v8673_v44 = vand.u32 4294901760, %v7196_v35  ;;  %v8677_v45 = vand.u32 4294901760, %v7203_v39  ;;  %v7220_v46 = vld [vmem:[#allocation2 + $0x58] sm:$0xff]  ;;  %v7231_v49 = vpack.c.bf16 %v8669_v31, %v8680_v26 }
 0x123   : > { %8804 = vst [vmem:[#allocation11_spill] sm:$0xff] %v7215_v42  ;;  %v7222_v47 = vld [vmem:[#allocation3 + $0x50] sm:$0xff]  ;;  %v7224_v48 = vld [vmem:[#allocation3 + $0x58] sm:$0xff]  ;;  %6210 = vmatprep.subr.bf16.mxu1 %v7188_v30  ;;  %v8676_v50 = vand.u32 4294901760, %v7205_v40  ;;  %v8679_v51 = vand.u32 4294901760, %v7207_v41  ;;  %v8678_v52 = vand.u32 4294901760, %v7220_v46  ;;  %v7251_v59 = vpack.c.bf16 %v8672_v36, %v8675_v32 }
 0x124   : > { %8805 = vst [vmem:[#allocation12_spill] sm:$0xff] %v7231_v49  ;;  %v7236_v53 = vld [vmem:[#allocation2 + $0x60] sm:$0xff]  ;;  %v7238_v54 = vld [vmem:[#allocation2 + $0x68] sm:$0xff]  ;;  %v8682_v55 = vand.u32 4294901760, %v7222_v47  ;;  %v8681_v56 = vand.u32 4294901760, %v7224_v48  ;;  %v7257_v60 = vpack.c.bf16 %v8670_v38, %v8671_v37  ;;  %v7261_v63 = vld [vmem:[#allocation2 + $0x70] sm:$0xff]  ;;  %v7274_v38 = vpack.c.bf16 %v8673_v44, %v8674_v43 }
 0x125   : > { %v7242_v57 = vld [vmem:[#allocation3 + $0x60] sm:$0xff]  ;;  %v7244_v58 = vld [vmem:[#allocation3 + $0x68] sm:$0xff]  ;;  %6020 = vmatpush3.bf16.msra.mxu0 %v7173_v24  ;;  %8806 = vst [vmem:[#allocation13_spill] sm:$0xff] %v7251_v59  ;;  %v8685_v61 = vand.u32 4294901760, %v7236_v53  ;;  %v8684_v62 = vand.u32 4294901760, %v7238_v54  ;;  %v7263_v0 = vld [vmem:[#allocation2 + $0x78] sm:$0xff]  ;;  %v7280_v37 = vpack.c.bf16 %v8676_v50, %v8677_v45  ;;  %v7286_v36 = vpack.c.bf16 %v8678_v52, %v8679_v51 }
 0x126   : > { %8807 = vst [vmem:[#allocation14_spill] sm:$0xff] %v7257_v60  ;;  %v510_v31 = vld [vmem:[%s8666_s4] sm:$0xff]  ;;  %6212 = vmatpush3.bf16.msra.mxu1 %v7188_v30  ;;  %6022 = vmatprep.subr.bf16.mxu0 %v7215_v42  ;;  %8808 = vst [vmem:[#allocation15_spill] sm:$0xff] %v7274_v38  ;;  %v7293_v44 = vpack.c.bf16 %v8681_v56, %v8682_v55  ;;  %v8709_v43 = vand.u32 4294901760, %v7242_v57  ;;  %v8708_v32 = vand.u32 4294901760, %v7244_v58  ;;  %v511_v45 = vld [vmem:[%s8666_s4 + $0x8] sm:$0xff] }
 0x127   : > { %8809 = vst [vmem:[#allocation16_spill] sm:$0xff] %v7280_v37  ;;  %8810 = vst [vmem:[#allocation17_spill] sm:$0xff] %v7286_v36  ;;  %6214 = vmatprep.subr.bf16.mxu1 %v7231_v49  ;;  %v7297_v50 = vand.u32 4294901760, %v510_v31  ;;  %v7307_v26 = vsub.f32 %v7124_v1, %v531_v4  ;;  %v7312_v56 = vsub.f32 %v7126_v2, %v534_v5  ;;  %v8821_v30 = vand.u32 4294901760, %v7142_v13 }
 0x128   : > { %8811 = vst [vmem:[#allocation18_spill] sm:$0xff] %v7293_v44  ;;  %v7319_v55 = vpack.c.bf16 %v8684_v62, %v8685_v61  ;;  %v7327_v1 = vsub.f32 %v7128_v3, %v1317_v7  ;;  %v7332_v2 = vsub.f32 %v7132_v6, %v1320_v10  ;;  %v7343_v3 = vsub.f32 %v7135_v8, %v537_v11  ;;  %v7346_v7 = vld [vmem:[#allocation3 + $0x70] sm:$0xff]  ;;  %v7348_v6 = vld [vmem:[#allocation3 + $0x78] sm:$0xff] }
 0x129   : > { %6024 = vmatpush3.bf16.msra.mxu0 %v7215_v42  ;;  %v7322_v25 = vsub.f32 %v510_v31, %v7297_v50  ;;  %v8690_v4 = vand.u32 4294901760, %v7307_v26  ;;  %v8689_v5 = vand.u32 4294901760, %v7312_v56  ;;  %v7338_v31 = vand.u32 4294901760, %v511_v45 }
 0x12a   : > { %8812 = vst [vmem:[#allocation19_spill] sm:$0xff] %v7319_v55  ;;  %6216 = vmatpush3.bf16.msra.mxu1 %v7231_v49  ;;  %6026 = vmatprep.subr.bf16.mxu0 %v7251_v59  ;;  %v8691_v62 = vand.u32 4294901760, %v7327_v1  ;;  %v8692_v61 = vand.u32 4294901760, %v7332_v2  ;;  %v7358_v20 = vsub.f32 %v7137_v9, %v540_v12  ;;  %v8699_v17 = vand.u32 4294901760, %v7343_v3 }
 0x12b   : > { %6218 = vmatprep.subr.bf16.mxu1 %v7257_v60  ;;  %v7351_v10 = vand.u32 4294901760, %v7322_v25  ;;  %v655_v8 = vsub.f32 %v7307_v26, %v8690_v4  ;;  %v662_v11 = vsub.f32 %v7312_v56, %v8689_v5  ;;  %v7367_v18 = vsub.f32 %v511_v45, %v7338_v31 }
 0x12c   : > { %v1441_v9 = vsub.f32 %v7327_v1, %v8691_v62  ;;  %v1448_v12 = vsub.f32 %v7332_v2, %v8692_v61  ;;  %v669_v62 = vsub.f32 %v7343_v3, %v8699_v17  ;;  %v7395_v61 = vpack.c.bf16 %v8708_v32, %v8709_v43 }
 0x12d   : > { %8813 = vst [vmem:[#allocation20_spill] sm:$0xff] %v7351_v10  ;;  %8814 = vst [vmem:[#allocation21_spill] sm:$0xff] %v7367_v18  ;;  %6028 = vmatpush3.bf16.msra.mxu0 %v7251_v59  ;;  %v614_v51 = vsub.f32 %v7322_v25, %v7351_v10  ;;  %v7385_v52 = vand.u32 4294901760, %v7367_v18  ;;  %v8817_v5 = vand.u32 4294901760, %v7261_v63  ;;  %v8818_v45 = vand.u32 4294901760, %v7263_v0 }
 0x12e   : > { %6220 = vmatpush3.bf16.msra.mxu1 %v7257_v60  ;;  %6030 = vmatprep.subr.bf16.mxu0 %v7274_v38  ;;  %8816 = vst [vmem:[#allocation23_spill] sm:$0xff] %v7395_v61  ;;  %v8820_v59 = vand.u32 4294901760, %v7358_v20  ;;  %v656_v17 = vand.u32 4294901760, %v655_v8  ;;  %v663_v49 = vand.u32 4294901760, %v662_v11  ;;  %v1442_v42 = vand.u32 4294901760, %v1441_v9 }
 0x12f   : > { %8815 = vst [vmem:[#allocation22_spill] sm:$0xff] %v7385_v52  ;;  %6222 = vmatprep.subr.bf16.mxu1 %v7280_v37  ;;  %v7401_v4 = vpack.c.bf16 %v8818_v45, %v8817_v5  ;;  %v615_v60 = vand.u32 4294901760, %v614_v51  ;;  %v7409_v24 = vsub.f32 %v7142_v13, %v8821_v30  ;;  %v1449_v32 = vand.u32 4294901760, %v1448_v12 }
 0x130   : > { %v676_v10 = vsub.f32 %v7358_v20, %v8820_v59  ;;  %v624_v5 = vsub.f32 %v7367_v18, %v7385_v52  ;;  %v8822_v51 = vand.u32 4294901760, %v7144_v14  ;;  %v8823_v59 = vand.u32 4294901760, %v7146_v15 }
 0x131   : > { %8819 = vst [vmem:[#allocation24_spill] sm:$0xff] %v7401_v4  ;;  %6032 = vmatpush3.bf16.msra.mxu0 %v7274_v38  ;;  %5205 = vmatprep.mubr.f32.mxu0 %v615_v60  ;;  %v670_v13 = vand.u32 4294901760, %v669_v62  ;;  %v8710_v30 = vand.u32 4294901760, %v7409_v24  ;;  %v8824_v11 = vand.u32 4294901760, %v7156_v19  ;;  %v8834_v18 = vand.u32 4294901760, %v7181_v29 }
 0x132   : > { %v7417_v45 = vsub.f32 %v7144_v14, %v8822_v51  ;;  %v7422_v8 = vsub.f32 %v7146_v15, %v8823_v59  ;;  %6224 = vmatpush3.bf16.msra.mxu1 %v7280_v37  ;;  %6034 = vmatprep.subr.bf16.mxu0 %v7286_v36  ;;  %v8825_v14 = vand.u32 4294901760, %v7159_v21  ;;  %v677_v15 = vand.u32 4294901760, %v676_v10 }
 0x133   : > { %v7430_v9 = vsub.f32 %v7156_v19, %v8824_v11  ;;  %6226 = vmatprep.subr.bf16.mxu1 %v7293_v44  ;;  %5433 = vmatprep.mubr.f32.mxu1 %v615_v60  ;;  %v8826_v59 = vand.u32 4294901760, %v7161_v22  ;;  %v1455_v19 = vsub.f32 %v7409_v24, %v8710_v30  ;;  %v8827_v60 = vand.u32 4294901760, %v7177_v27 }
 0x134   : > { %v7435_v12 = vsub.f32 %v7159_v21, %v8825_v14  ;;  %v8711_v51 = vand.u32 4294901760, %v7417_v45  ;;  %v8712_v62 = vand.u32 4294901760, %v7422_v8  ;;  %v8828_v30 = vand.u32 4294901760, %v7179_v28 }
 0x135   : > { %v7443_v43 = vsub.f32 %v7161_v22, %v8826_v59  ;;  %v8725_v21 = vand.u32 4294901760, %v7430_v9  ;;  %v7453_v10 = vsub.f32 %v7177_v27, %v8827_v60  ;;  %6036 = vmatpush3.bf16.msra.mxu0 %v7286_v36  ;;  %v8829_v27 = vand.u32 4294901760, %v7346_v7 }
 0x136   : > { %v1462_v22 = vsub.f32 %v7417_v45, %v8711_v51  ;;  %v683_v14 = vsub.f32 %v7422_v8, %v8712_v62  ;;  %v7466_v11 = vsub.f32 %v7179_v28, %v8828_v30  ;;  %6228 = vmatpush3.bf16.msra.mxu1 %v7293_v44  ;;  %6038 = vmatprep.subr.bf16.mxu0 %v7319_v55  ;;  %v8830_v60 = vand.u32 4294901760, %v7348_v6 }
 0x137   : > { %v690_v62 = vsub.f32 %v7430_v9, %v8725_v21  ;;  %v8832_v59 = vand.u32 4294901760, %v7435_v12  ;;  %6230 = vmatprep.subr.bf16.mxu1 %v7395_v61  ;;  %v6045_v28 = vpack.c.bf16 %v663_v49, %v656_v17  ;;  %v1456_v30 = vand.u32 4294901760, %v1455_v19 }
 0x138   : > { %v7474_v51 = vpack.c.bf16 %v8830_v60, %v8829_v27  ;;  %v1463_v44 = vand.u32 4294901760, %v1462_v22  ;;  %v8731_v36 = vand.u32 4294901760, %v7453_v10  ;;  %v6237_v37 = vpack.c.bf16 %v1449_v32, %v1442_v42 }
 0x139   : > { %v1469_v52 = vsub.f32 %v7435_v12, %v8832_v59  ;;  %v625_v38 = vand.u32 4294901760, %v624_v5  ;;  %v8833_v27 = vand.u32 4294901760, %v7443_v43  ;;  %v7490_v21 = vsub.f32 %v7181_v29, %v8834_v18  ;;  %6040 = vmatpush3.bf16.msra.mxu0 %v7319_v55 }
 0x13a   : > { %8831 = vst [vmem:[#allocation25_spill] sm:$0xff] %v7474_v51  ;;  %v6049_v59 = vpack.c.bf16 %v677_v15, %v670_v13  ;;  %v684_v23 = vand.u32 4294901760, %v683_v14  ;;  %v8729_v17 = vand.u32 4294901760, %v7466_v11  ;;  %v8835_v49 = vand.u32 4294901760, %v7192_v33  ;;  %6232 = vmatpush3.bf16.msra.mxu1 %v7395_v61  ;;  %6042 = vmatprep.subr.bf16.mxu0 %v7401_v4 }
 0x13b   : > { %v1476_v60 = vsub.f32 %v7443_v43, %v8833_v27  ;;  %v691_v42 = vand.u32 4294901760, %v690_v62  ;;  %v1470_v5 = vand.u32 4294901760, %v1469_v52  ;;  %v8728_v18 = vand.u32 4294901760, %v7490_v21  ;;  %6234 = vmatprep.subr.bf16.mxu1 %v7474_v51 }
 0x13c   : > { %v7497_v32 = vsub.f32 %v7192_v33, %v8835_v49  ;;  %v8836_v29 = vand.u32 4294901760, %v7194_v34  ;;  %v6241_v15 = vpack.c.bf16 %v1463_v44, %v1456_v30  ;;  %v697_v33 = vsub.f32 %v7453_v10, %v8731_v36 }
 0x13d   : > { %v8837_v22 = vand.u32 4294901760, %v7196_v35  ;;  %v1477_v62 = vand.u32 4294901760, %v1476_v60  ;;  %v8839_v44 = vand.u32 4294901760, %v7205_v40  ;;  %6044 = vmatpush3.bf16.msra.mxu0 %v7401_v4  ;;  %v1483_v60 = vsub.f32 %v7490_v21, %v8728_v18 }
 0x13e   : > { %v7505_v13 = vsub.f32 %v7194_v34, %v8836_v29  ;;  %v8730_v19 = vand.u32 4294901760, %v7497_v32  ;;  %v8838_v34 = vand.u32 4294901760, %v7203_v39  ;;  %6236 = vmatpush3.bf16.msra.mxu1 %v7474_v51  ;;  %6046 = vmatprep.subr.bf16.mxu0 %v6045_v28  ;;  %v6053_v18 = vpack.c.bf16 %v691_v42, %v684_v23 }
 0x13f   : > { %v7515_v52 = vsub.f32 %v7196_v35, %v8837_v22  ;;  %v7526_v30 = vsub.f32 %v7205_v40, %v8839_v44  ;;  %v704_v35 = vsub.f32 %v7466_v11, %v8729_v17  ;;  %6238 = vmatprep.subr.bf16.mxu1 %v6237_v37  ;;  %v8841_v17 = vand.u32 4294901760, %v7220_v46 }
 0x140   : > { %v8732_v14 = vand.u32 4294901760, %v7505_v13  ;;  %v7521_v27 = vsub.f32 %v7203_v39, %v8838_v34  ;;  %v8840_v39 = vand.u32 4294901760, %v7207_v41  ;;  %v1490_v40 = vsub.f32 %v7497_v32, %v8730_v19  ;;  %5206 = vmatmul.mubr.f32.vlgmr.msra.gmra.mrb[0].mxu0 %v625_v38 }
 0x141   : > { %v8733_v49 = vand.u32 4294901760, %v7515_v52  ;;  %v8739_v44 = vand.u32 4294901760, %v7526_v30  ;;  %v7557_v19 = vsub.f32 %v7220_v46, %v8841_v17  ;;  %v698_v36 = vand.u32 4294901760, %v697_v33  ;;  %6048 = vmatpush3.bf16.msra.mxu0 %v6045_v28  ;;  %5434 = vmatmul.mubr.f32.vlgmr.msra.gmra.mrb[0].mxu1 %v625_v38 }
 0x142   : > { %v7539_v29 = vsub.f32 %v7207_v41, %v8840_v39  ;;  %v711_v22 = vsub.f32 %v7505_v13, %v8732_v14  ;;  %v8736_v34 = vand.u32 4294901760, %v7521_v27  ;;  %v8842_v42 = vand.u32 4294901760, %v7222_v47  ;;  %6240 = vmatpush3.bf16.msra.mxu1 %v6237_v37  ;;  %6050 = vmatprep.subr.bf16.mxu0 %v6049_v59 }
 0x143   : > { %v718_v41 = vsub.f32 %v7515_v52, %v8733_v49  ;;  %v1504_v23 = vsub.f32 %v7526_v30, %v8739_v44  ;;  %v6245_v39 = vpack.c.bf16 %v1477_v62, %v1470_v5  ;;  %v705_v46 = vand.u32 4294901760, %v704_v35  ;;  %6242 = vmatprep.subr.bf16.mxu1 %v6241_v15  ;;  %v512_v35 = vld [vmem:[%s8666_s4 + $0x10] sm:$0xff] }
 0x144   : > { %v1497_v14 = vsub.f32 %v7521_v27, %v8736_v34  ;;  %v7568_v49 = vsub.f32 %v7222_v47, %v8842_v42  ;;  %v1484_v17 = vand.u32 4294901760, %v1483_v60  ;;  %v8743_v33 = vand.u32 4294901760, %v7557_v19 }
 0x145   : > { %v1491_v51 = vand.u32 4294901760, %v1490_v40  ;;  %v712_v34 = vand.u32 4294901760, %v711_v22  ;;  %v8843_v44 = vand.u32 4294901760, %v7224_v48  ;;  %v719_v47 = vand.u32 4294901760, %v718_v41  ;;  %6052 = vmatpush3.bf16.msra.mxu0 %v6049_v59 }
 0x146   : > { %v8742_v4 = vand.u32 4294901760, %v7568_v49  ;;  %v1498_v28 = vand.u32 4294901760, %v1497_v14  ;;  %v8844_v38 = vand.u32 4294901760, %v7539_v29  ;;  %v8845_v62 = vand.u32 4294901760, %v7236_v53  ;;  %6244 = vmatpush3.bf16.msra.mxu1 %v6241_v15  ;;  %6054 = vmatprep.subr.bf16.mxu0 %v6053_v18 }
 0x147   : > { %v7575_v61 = vsub.f32 %v7224_v48, %v8843_v44  ;;  %v1505_v60 = vand.u32 4294901760, %v1504_v23  ;;  %v732_v48 = vsub.f32 %v7557_v19, %v8743_v33  ;;  %v8846_v40 = vand.u32 4294901760, %v7238_v54  ;;  %6246 = vmatprep.subr.bf16.mxu1 %v6245_v39 }
 0x148   : > { %v725_v5 = vsub.f32 %v7539_v29, %v8844_v38  ;;  %v7583_v37 = vsub.f32 %v7236_v53, %v8845_v62  ;;  %v1511_v53 = vsub.f32 %v7568_v49, %v8742_v4  ;;  %v8847_v41 = vand.u32 4294901760, %v7242_v57 }
 0x149   : > { %v8744_v14 = vand.u32 4294901760, %v7575_v61  ;;  %v7595_v22 = vsub.f32 %v7238_v54, %v8846_v40  ;;  %v8848_v42 = vand.u32 4294901760, %v7244_v58  ;;  %v6057_v54 = vpack.c.bf16 %v705_v46, %v698_v36  ;;  %6056 = vmatpush3.bf16.msra.mxu0 %v6053_v18  ;;  %v513_v18 = vld [vmem:[%s8666_s4 + $0x18] sm:$0xff] }
 0x14a   : > { %v8745_v44 = vand.u32 4294901760, %v7583_v37  ;;  %v7604_v23 = vsub.f32 %v7242_v57, %v8847_v41  ;;  %v7615_v40 = vand.u32 4294901760, %v512_v35  ;;  %v6249_v4 = vpack.c.bf16 %v1491_v51, %v1484_v17  ;;  %6248 = vmatpush3.bf16.msra.mxu1 %v6245_v39 }
 0x14b   : > { %v7609_v38 = vsub.f32 %v7244_v58, %v8848_v42  ;;  %v1518_v59 = vsub.f32 %v7575_v61, %v8744_v14  ;;  %v8747_v62 = vand.u32 4294901760, %v7595_v22  ;;  %v726_v57 = vand.u32 4294901760, %v725_v5  ;;  %6058 = vmatprep.subr.bf16.mxu0 %v6057_v54 }
 0x14c   : > { %v8746_v41 = vand.u32 4294901760, %v7604_v23  ;;  %v733_v58 = vand.u32 4294901760, %v732_v48  ;;  %v739_v36 = vsub.f32 %v7583_v37, %v8745_v44  ;;  %v7623_v15 = vsub.f32 %v512_v35, %v7615_v40  ;;  %6250 = vmatprep.subr.bf16.mxu1 %v6249_v4 }
 0x14d   : > { %v8849_v46 = vand.u32 4294901760, %v7261_v63  ;;  %v6061_v51 = vpack.c.bf16 %v719_v47, %v712_v34  ;;  %v6253_v17 = vpack.c.bf16 %v1505_v60, %v1498_v28  ;;  %v1512_v5 = vand.u32 4294901760, %v1511_v53  ;;  %6060 = vmatpush3.bf16.msra.mxu0 %v6057_v54 }
 0x14e   : > { %v8850_v14 = vand.u32 4294901760, %v7263_v0  ;;  %v1519_v44 = vand.u32 4294901760, %v1518_v59  ;;  %v746_v35 = vsub.f32 %v7595_v22, %v8747_v62  ;;  %v7639_v33 = vand.u32 4294901760, %v7623_v15  ;;  %6252 = vmatpush3.bf16.msra.mxu1 %v6249_v4 }
 0x14f   : > { %v7628_v42 = vsub.f32 %v7261_v63, %v8849_v46  ;;  %v8852_v34 = vand.u32 4294901760, %v7609_v38  ;;  %v8853_v28 = vand.u32 4294901760, %v7346_v7  ;;  %v740_v53 = vand.u32 4294901760, %v739_v36  ;;  %6062 = vmatprep.subr.bf16.mxu0 %v6061_v51  ;;  %6254 = vmatprep.subr.bf16.mxu1 %v6253_v17 }
 0x150   : > { %v7633_v48 = vsub.f32 %v7263_v0, %v8850_v14  ;;  %8851 = vst [vmem:[#allocation26_spill] sm:$0xff] %v7639_v33  ;;  %v1525_v0 = vsub.f32 %v7604_v23, %v8746_v41  ;;  %v6065_v14 = vpack.c.bf16 %v733_v58, %v726_v57  ;;  %v634_v59 = vsub.f32 %v7623_v15, %v7639_v33 }
 0x151   : > { %v8748_v63 = vand.u32 4294901760, %v7628_v42  ;;  %v1532_v39 = vsub.f32 %v7609_v38, %v8852_v34  ;;  %v7655_v60 = vsub.f32 %v7346_v7, %v8853_v28  ;;  %v8854_v46 = vand.u32 4294901760, %v7348_v6  ;;  %6064 = vmatpush3.bf16.msra.mxu0 %v6061_v51 }
 0x152   : > { %v8751_v47 = vand.u32 4294901760, %v7633_v48  ;;  %v7671_v58 = vand.u32 4294901760, %v513_v18  ;;  %v6257_v36 = vpack.c.bf16 %v1519_v44, %v1512_v5  ;;  %v747_v28 = vand.u32 4294901760, %v746_v35  ;;  %6256 = vmatpush3.bf16.msra.mxu1 %v6253_v17  ;;  %6066 = vmatprep.subr.bf16.mxu0 %v6065_v14 }
 0x153   : > { %v7662_v41 = vsub.f32 %v7348_v6, %v8854_v46  ;;  %v753_v34 = vsub.f32 %v7628_v42, %v8748_v63  ;;  %v1538_v57 = vand.u32 4294901760, %v7655_v60  ;;  %v635_v62 = vand.u32 4294901760, %v634_v59 }
 0x154   : > { %v760_v7 = vsub.f32 %v7633_v48, %v8751_v47  ;;  %v1526_v54 = vand.u32 4294901760, %v1525_v0  ;;  %v1533_v46 = vand.u32 4294901760, %v1532_v39  ;;  %v7676_v33 = vsub.f32 %v513_v18, %v7671_v58  ;;  %6258 = vmatprep.subr.bf16.mxu1 %v6257_v36 }
 0x155   : > { %v1545_v6 = vand.u32 4294901760, %v7662_v41  ;;  %v1539_v63 = vsub.f32 %v7655_v60, %v1538_v57  ;;  %5208 = vmatprep.mubr.f32.mxu0 %v635_v62  ;;  %5436 = vmatprep.mubr.f32.mxu1 %v635_v62  ;;  %v754_v4 = vand.u32 4294901760, %v753_v34  ;;  %v6069_v35 = vpack.c.bf16 %v747_v28, %v740_v53 }
 0x156   : > { %v761_v55 = vand.u32 4294901760, %v760_v7  ;;  %v7680_v5 = vand.u32 4294901760, %v7676_v33  ;;  %v6261_v39 = vpack.c.bf16 %v1533_v46, %v1526_v54  ;;  %v6077_v62 = vpack.c.bf16 %v7312_v56, %v7307_v26  ;;  %6068 = vmatpush3.bf16.msra.mxu0 %v6065_v14  ;;  %6260 = vmatpush3.bf16.msra.mxu1 %v6257_v36 }
 0x157   : > { %v1546_v47 = vsub.f32 %v7662_v41, %v1545_v6  ;;  %v1540_v44 = vand.u32 4294901760, %v1539_v63  ;;  %v8855_v63 = vand.u32 4294901760, %v7307_v26  ;;  %v8856_v7 = vand.u32 4294901760, %v7312_v56  ;;  %6070 = vmatprep.subr.bf16.mxu0 %v6069_v35 }
 0x158   : > { %v644_v18 = vsub.f32 %v7676_v33, %v7680_v5  ;;  %v6073_v51 = vpack.c.bf16 %v761_v55, %v754_v4  ;;  %v8858_v53 = vand.u32 4294901760, %v7332_v2  ;;  %v8859_v54 = vand.u32 4294901760, %v7343_v3  ;;  %6262 = vmatprep.subr.bf16.mxu1 %v6261_v39 }
 0x159   : > { %v1547_v0 = vand.u32 4294901760, %v1546_v47  ;;  %v7690_v17 = vpack.c.bf16 %v8856_v7, %v8855_v63  ;;  %v8857_v47 = vand.u32 4294901760, %v7327_v1  ;;  %v8860_v55 = vand.u32 4294901760, %v7358_v20 }
 0x15a   : > { %v645_v34 = vand.u32 4294901760, %v644_v18  ;;  %v8861_v26 = vand.u32 4294901760, %v7409_v24  ;;  %v8862_v56 = vand.u32 4294901760, %v7417_v45  ;;  %v8863_v36 = vand.u32 4294901760, %v7422_v8  ;;  %6072 = vmatpush3.bf16.msra.mxu0 %v6069_v35  ;;  %6264 = vmatpush3.bf16.msra.mxu1 %v6261_v39 }
 0x15b   : > { %v6265_v59 = vpack.c.bf16 %v1547_v0, %v1540_v44  ;;  %v7696_v28 = vpack.c.bf16 %v8858_v53, %v8857_v47  ;;  %v7702_v14 = vpack.c.bf16 %v8860_v55, %v8859_v54  ;;  %v8864_v4 = vand.u32 4294901760, %v7430_v9  ;;  %6074 = vmatprep.subr.bf16.mxu0 %v6073_v51 }
 0x15c   : > { %v7708_v46 = vpack.c.bf16 %v8862_v56, %v8861_v26  ;;  %5209 = vmatmul.mubr.f32.gmra.mrb[2].mxu0 %v645_v34  ;;  %v8865_v0 = vand.u32 4294901760, %v7435_v12  ;;  %v8866_v18 = vand.u32 4294901760, %v7443_v43  ;;  %v8867_v7 = vand.u32 4294901760, %v7453_v10  ;;  %5437 = vmatmul.mubr.f32.gmra.mrb[2].mxu1 %v645_v34 }
 0x15d   : > { %v7714_v44 = vpack.c.bf16 %v8864_v4, %v8863_v36  ;;  %v8868_v47 = vand.u32 4294901760, %v7466_v11  ;;  %5243 = vmatprep.mubr.f32.mxu0 %v7297_v50  ;;  %v8869_v54 = vand.u32 4294901760, %v7490_v21  ;;  %v8870_v55 = vand.u32 4294901760, %v7497_v32  ;;  %5471 = vmatprep.mubr.f32.mxu1 %v7297_v50 }
 0x15e   : > { %v7720_v63 = vpack.c.bf16 %v8866_v18, %v8865_v0  ;;  %v8871_v56 = vand.u32 4294901760, %v7505_v13  ;;  %v8872_v36 = vand.u32 4294901760, %v7515_v52  ;;  %v8874_v0 = vand.u32 4294901760, %v7521_v27  ;;  %6266 = vmatprep.subr.bf16.mxu1 %v6265_v59  ;;  %6076 = vmatpush3.bf16.msra.mxu0 %v6073_v51  ;;  %v496_v51 = vld [vmem:[%s8665_s3 + $0x10] sm:$0xff] }
 0x15f   : > { %v7726_v53 = vpack.c.bf16 %v8868_v47, %v8867_v7  ;;  %v7733_v26 = vpack.c.bf16 %v8870_v55, %v8869_v54  ;;  %v8875_v18 = vand.u32 4294901760, %v7526_v30  ;;  %v8877_v34 = vand.u32 4294901760, %v7539_v29  ;;  %6268 = vmatpush3.bf16.msra.mxu1 %v6265_v59  ;;  %6078 = vmatprep.subr.bf16.mxu0 %v6077_v62  ;;  %v497_v59 = vld [vmem:[%s8665_s3 + $0x18] sm:$0xff] }
 0x160   : > { %v7739_v4 = vpack.c.bf16 %v8872_v36, %v8871_v56  ;;  %v8878_v47 = vand.u32 4294901760, %v7557_v19  ;;  %v8880_v55 = vand.u32 4294901760, %v7568_v49  ;;  %v8881_v56 = vand.u32 4294901760, %v7575_v61 }
 0x161   : > { %v7745_v7 = vpack.c.bf16 %v8875_v18, %v8874_v0  ;;  %v8883_v0 = vand.u32 4294901760, %v7595_v22  ;;  %v8884_v35 = vand.u32 4294901760, %v7604_v23  ;;  %v6081_v39 = vpack.c.bf16 %v7358_v20, %v7343_v3  ;;  %5244 = vmatmul.mubr.f32.vlgmr.msra.gmra.mrb[0].mxu0 %v7338_v31 }
 0x162   : > { %8873 = vst [vmem:[#allocation27_spill] sm:$0xff] %v7739_v4  ;;  %v7752_v54 = vpack.c.bf16 %v8878_v47, %v8877_v34  ;;  %v7758_v36 = vpack.c.bf16 %v8881_v56, %v8880_v55  ;;  %v8882_v4 = vand.u32 4294901760, %v7583_v37  ;;  %v8886_v47 = vand.u32 4294901760, %v7628_v42  ;;  %6080 = vmatpush3.bf16.msra.mxu0 %v6077_v62  ;;  %5472 = vmatmul.mubr.f32.vlgmr.msra.gmra.mrb[0].mxu1 %v7338_v31 }
 0x163   : > { %8876 = vst [vmem:[#allocation28_spill] sm:$0xff] %v7745_v7  ;;  %v8885_v7 = vand.u32 4294901760, %v7609_v38  ;;  %v7778_v56 = vpack.c.bf16 %v1545_v6, %v1538_v57  ;;  %6082 = vmatprep.subr.bf16.mxu0 %v6081_v39  ;;  %5246 = vmatprep.mubr.f32.mxu0 %v7615_v40  ;;  %v6089_v20 = vpack.c.bf16 %v7466_v11, %v7453_v10  ;;  %v8889_v11 = vld [vmem:[#allocation21_spill] sm:$0xff] }
 0x164   : > { %8879 = vst [vmem:[#allocation29_spill] sm:$0xff] %v7752_v54  ;;  %v7764_v18 = vpack.c.bf16 %v8883_v0, %v8882_v4  ;;  %v8887_v54 = vand.u32 4294901760, %v7633_v48  ;;  %v6269_v4 = vpack.c.bf16 %v7332_v2, %v7327_v1  ;;  %v6085_v1 = vpack.c.bf16 %v7430_v9, %v7422_v8  ;;  %5474 = vmatprep.mubr.f32.mxu1 %v7615_v40  ;;  %v8890_v10 = vld [vmem:[#allocation9_spill] sm:$0xff] }
 0x165   : > { %v7770_v34 = vpack.c.bf16 %v8885_v7, %v8884_v35  ;;  %v6273_v7 = vpack.c.bf16 %v7417_v45, %v7409_v24  ;;  %v6277_v2 = vpack.c.bf16 %v7443_v43, %v7435_v12  ;;  %5247 = vmatmul.mubr.f32.gmra.mrb[2].mxu0 %v7671_v58  ;;  %v6281_v24 = vpack.c.bf16 %v7497_v32, %v7490_v21  ;;  %v8888_v21 = vld [vmem:[#allocation8_spill] sm:$0xff]  ;;  %v8891_v32 = vld [vmem:[#allocation10_spill] sm:$0xff] }
 0x166   : > { %v7776_v55 = vpack.c.bf16 %v8887_v54, %v8886_v47  ;;  %6270 = vmatprep.subr.bf16.mxu1 %v6269_v4  ;;  %6084 = vmatpush3.bf16.msra.mxu0 %v6081_v39  ;;  %v6093_v43 = vpack.c.bf16 %v7515_v52, %v7505_v13  ;;  %v6285_v3 = vpack.c.bf16 %v7526_v30, %v7521_v27  ;;  %v8892_v13 = vld [vmem:[#allocation11_spill] sm:$0xff]  ;;  %v8894_v52 = vld [vmem:[#allocation20_spill] sm:$0xff]  ;;  %v8895_v27 = vld [vmem:[#allocation13_spill] sm:$0xff] }
 0x167   : > { %6272 = vmatpush3.bf16.msra.mxu1 %v6269_v4  ;;  %6086 = vmatprep.subr.bf16.mxu0 %v6085_v1  ;;  %v6097_v45 = vpack.c.bf16 %v7557_v19, %v7539_v29  ;;  %v6101_v8 = vpack.c.bf16 %v7595_v22, %v7583_v37  ;;  %v6293_v9 = vpack.c.bf16 %v7609_v38, %v7604_v23  ;;  %v8893_v19 = vld [vmem:[#allocation12_spill] sm:$0xff]  ;;  %v8896_v30 = vld [vmem:[#allocation14_spill] sm:$0xff]  ;;  %v8901_v22 = vld [vmem:[#allocation19_spill] sm:$0xff] }
 0x168   : > { %6274 = vmatprep.subr.bf16.mxu1 %v6273_v7  ;;  %5475 = vmatmul.mubr.f32.gmra.mrb[2].mxu1 %v7671_v58  ;;  %v6105_v12 = vpack.c.bf16 %v7633_v48, %v7628_v42  ;;  %v8898_v29 = vld [vmem:[#allocation16_spill] sm:$0xff]  ;;  %v8900_v37 = vld [vmem:[#allocation18_spill] sm:$0xff]  ;;  %v8902_v23 = vld [vmem:[#allocation23_spill] sm:$0xff] }
 0x169   : > { %5281 = vmatprep.mubr.f32.mxu0 %v7322_v25  ;;  %5509 = vmatprep.mubr.f32.mxu1 %v7322_v25  ;;  %v6289_v25 = vpack.c.bf16 %v7575_v61, %v7568_v49  ;;  %v6297_v61 = vpack.c.bf16 %v7662_v41, %v7655_v60  ;;  %v8897_v49 = vld [vmem:[#allocation15_spill] sm:$0xff]  ;;  %v8903_v38 = vld [vmem:[#allocation24_spill] sm:$0xff]  ;;  %v8904_v41 = vld [vmem:[#allocation25_spill] sm:$0xff] }
 0x16a   : > { %6088 = vmatpush3.bf16.msra.mxu0 %v6085_v1  ;;  %v8906_v42 = vld [vmem:[#allocation26_spill] sm:$0xff]  ;;  %v8907_v48 = vld [vmem:[#allocation27_spill] sm:$0xff]  ;;  %v8908_v60 = vld [vmem:[#allocation28_spill] sm:$0xff] }
 0x16b   : > { %6276 = vmatpush3.bf16.msra.mxu1 %v6273_v7  ;;  %6090 = vmatprep.subr.bf16.mxu0 %v6089_v20  ;;  %v8909_v57 = vld [vmem:[#allocation29_spill] sm:$0xff]  ;;  %v500_v35 = vld [vmem:[%s8665_s3 + $0x30] sm:$0xff] }
 0x16c   : > { %6278 = vmatprep.subr.bf16.mxu1 %v6277_v2  ;;  %v499_v54 = vld [vmem:[%s8665_s3 + $0x28] sm:$0xff] }
 0x16e   : > { %6092 = vmatpush3.bf16.msra.mxu0 %v6089_v20 }
 0x16f   : > { %6280 = vmatpush3.bf16.msra.mxu1 %v6277_v2  ;;  %6094 = vmatprep.subr.bf16.mxu0 %v6093_v43  ;;  %v502_v2 = vld [vmem:[%s8665_s3 + $0x40] sm:$0xff] }
 0x170   : > { %6282 = vmatprep.subr.bf16.mxu1 %v6281_v24 }
 0x172   : > { %6096 = vmatpush3.bf16.msra.mxu0 %v6093_v43  ;;  %v503_v43 = vld [vmem:[%s8665_s3 + $0x48] sm:$0xff] }
 0x173   : > { %6284 = vmatpush3.bf16.msra.mxu1 %v6281_v24  ;;  %6098 = vmatprep.subr.bf16.mxu0 %v6097_v45 }
 0x174   : > { %6286 = vmatprep.subr.bf16.mxu1 %v6285_v3 }
 0x176   : > { %6100 = vmatpush3.bf16.msra.mxu0 %v6097_v45 }
 0x177   : > { %6288 = vmatpush3.bf16.msra.mxu1 %v6285_v3  ;;  %6102 = vmatprep.subr.bf16.mxu0 %v6101_v8 }
 0x178   : > { %6290 = vmatprep.subr.bf16.mxu1 %v6289_v25 }
 0x17a   : > { %6104 = vmatpush3.bf16.msra.mxu0 %v6101_v8 }
 0x17b   : > { %6292 = vmatpush3.bf16.msra.mxu1 %v6289_v25  ;;  %6106 = vmatprep.subr.bf16.mxu0 %v6105_v12  ;;  %v2137_v25 = vsel %vm2111_vm2, %v502_v2, 0 }
 0x17c   : > { %6294 = vmatprep.subr.bf16.mxu1 %v6293_v9 }
 0x17e   : > { %6108 = vmatpush3.bf16.msra.mxu0 %v6105_v12 }
 0x17f   : > { %6296 = vmatpush3.bf16.msra.mxu1 %v6293_v9  ;;  %6110 = vmatprep.subr.bf16.mxu0 %v7152_v16 }
 0x180   : > { %6298 = vmatprep.subr.bf16.mxu1 %v6297_v61 }
 0x181   : > { %5282 = vmatmul.mubr.f32.vlgmr.msra.gmra.mrb[0].mxu0 %v8889_v11 }
 0x182   : > { %6112 = vmatpush3.bf16.msra.mxu0 %v7152_v16  ;;  %5284 = vmatprep.mubr.f32.mxu0 %v7623_v15 }
 0x183   : > { %6300 = vmatpush3.bf16.msra.mxu1 %v6297_v61  ;;  %6114 = vmatprep.subr.bf16.mxu0 %v8890_v10  ;;  %v2140_v61 = vsel %vm2111_vm2, %v503_v43, 0 }
 0x184   : > { %6302 = vmatprep.subr.bf16.mxu1 %v8888_v21 }
 0x185   : > { %5285 = vmatmul.mubr.f32.gmra.mrb[2].mxu0 %v7676_v33 }
 0x186   : > { %5510 = vmatmul.mubr.f32.vlgmr.msra.gmra.mrb[0].mxu1 %v8889_v11  ;;  %6116 = vmatpush3.bf16.msra.mxu0 %v8890_v10 }
 0x187   : > { %6304 = vmatpush3.bf16.msra.mxu1 %v8888_v21  ;;  %5512 = vmatprep.mubr.f32.mxu1 %v7623_v15  ;;  %v8905_v15 = vld [vmem:[#allocation22_spill] sm:$0xff] }
 0x188   : > { %6306 = vmatprep.subr.bf16.mxu1 %v8891_v32  ;;  %6118 = vmatprep.subr.bf16.mxu0 %v8892_v13 }
 0x189   : > { %5319 = vmatprep.mubr.f32.mxu0 %v8894_v52 }
 0x18a   : > { %5513 = vmatmul.mubr.f32.gmra.mrb[2].mxu1 %v7676_v33  ;;  %6120 = vmatpush3.bf16.msra.mxu0 %v8892_v13  ;;  %v8899_v33 = vld [vmem:[#allocation17_spill] sm:$0xff] }
 0x18b   : > { %6308 = vmatpush3.bf16.msra.mxu1 %v8891_v32  ;;  %5547 = vmatprep.mubr.f32.mxu1 %v8894_v52  ;;  %v8052_v52 = vand.u32 4294901760, %v2140_v61 }
 0x18c   : > { %6310 = vmatprep.subr.bf16.mxu1 %v8893_v19  ;;  %6122 = vmatprep.subr.bf16.mxu0 %v8895_v27 }
 0x18e   : > { %6124 = vmatpush3.bf16.msra.mxu0 %v8895_v27 }
 0x18f   : > { %6312 = vmatpush3.bf16.msra.mxu1 %v8893_v19  ;;  %6126 = vmatprep.subr.bf16.mxu0 %v8897_v49 }
 0x190   : > { %6314 = vmatprep.subr.bf16.mxu1 %v8896_v30 }
 0x192   : > { %6128 = vmatpush3.bf16.msra.mxu0 %v8897_v49 }
 0x193   : > { %6316 = vmatpush3.bf16.msra.mxu1 %v8896_v30  ;;  %6130 = vmatprep.subr.bf16.mxu0 %v8899_v33 }
 0x194   : > { %6318 = vmatprep.subr.bf16.mxu1 %v8898_v29 }
 0x196   : > { %6132 = vmatpush3.bf16.msra.mxu0 %v8899_v33 }
 0x197   : > { %6320 = vmatpush3.bf16.msra.mxu1 %v8898_v29  ;;  %6134 = vmatprep.subr.bf16.mxu0 %v8901_v22 }
 0x198   : > { %6322 = vmatprep.subr.bf16.mxu1 %v8900_v37 }
 0x19a   : > { %6136 = vmatpush3.bf16.msra.mxu0 %v8901_v22 }
 0x19b   : > { %6324 = vmatpush3.bf16.msra.mxu1 %v8900_v37  ;;  %6138 = vmatprep.subr.bf16.mxu0 %v8903_v38 }
 0x19c   : > { %6326 = vmatprep.subr.bf16.mxu1 %v8902_v23 }
 0x19e   : > { %6140 = vmatpush3.bf16.msra.mxu0 %v8903_v38 }
 0x19f   : > { %6328 = vmatpush3.bf16.msra.mxu1 %v8902_v23  ;;  %6142 = vmatprep.subr.bf16.mxu0 %v7690_v17 }
 0x1a0   : > { %6330 = vmatprep.subr.bf16.mxu1 %v8904_v41 }
 0x1a1   : > { %5320 = vmatmul.mubr.f32.vlgmr.msra.gmra.mrb[0].mxu0 %v8905_v15 }
 0x1a2   : > { %6144 = vmatpush3.bf16.msra.mxu0 %v7690_v17  ;;  %5322 = vmatprep.mubr.f32.mxu0 %v8906_v42 }
 0x1a3   : > { %6332 = vmatpush3.bf16.msra.mxu1 %v8904_v41  ;;  %6146 = vmatprep.subr.bf16.mxu0 %v7702_v14 }
 0x1a4   : > { %6334 = vmatprep.subr.bf16.mxu1 %v7696_v28 }
 0x1a5   : > { %5323 = vmatmul.mubr.f32.gmra.mrb[2].mxu0 %v7680_v5 }
 0x1a6   : > { %5548 = vmatmul.mubr.f32.vlgmr.msra.gmra.mrb[0].mxu1 %v8905_v15  ;;  %6148 = vmatpush3.bf16.msra.mxu0 %v7702_v14  ;;  %v2122_v14 = vsel %vm2111_vm2, %v497_v59, 0 }
 0x1a7   : > { %6336 = vmatpush3.bf16.msra.mxu1 %v7696_v28  ;;  %5550 = vmatprep.mubr.f32.mxu1 %v8906_v42  ;;  %v2119_v28 = vsel %vm2111_vm2, %v496_v51, 0 }
 0x1a8   : > { %6338 = vmatprep.subr.bf16.mxu1 %v7708_v46  ;;  %6150 = vmatprep.subr.bf16.mxu0 %v7714_v44 }
 0x1a9   : > { %5357 = vmatprep.mubr.f32.mxu0 %v7297_v50 }
 0x1aa   : > { %5551 = vmatmul.mubr.f32.gmra.mrb[2].mxu1 %v7680_v5  ;;  %6152 = vmatpush3.bf16.msra.mxu0 %v7714_v44 }
 0x1ab   : > { %6340 = vmatpush3.bf16.msra.mxu1 %v7708_v46  ;;  %5585 = vmatprep.mubr.f32.mxu1 %v7297_v50  ;;  %v498_v46 = vld [vmem:[%s8665_s3 + $0x20] sm:$0xff] }
 0x1ac   : > { %6342 = vmatprep.subr.bf16.mxu1 %v7720_v63  ;;  %6154 = vmatprep.subr.bf16.mxu0 %v7726_v53 }
 0x1ae   : > { %6156 = vmatpush3.bf16.msra.mxu0 %v7726_v53  ;;  %v7977_v53 = vand.u32 4294901760, %v2122_v14 }
 0x1af   : > { %6344 = vmatpush3.bf16.msra.mxu1 %v7720_v63  ;;  %6158 = vmatprep.subr.bf16.mxu0 %v8907_v48  ;;  %v7975_v63 = vand.u32 4294901760, %v2119_v28 }
 0x1b0   : > { %6346 = vmatprep.subr.bf16.mxu1 %v7733_v26 }
 0x1b1   : > { %v7987_v0 = vsub.f32 %v2119_v28, %v7975_v63 }
 0x1b2   : > { %6160 = vmatpush3.bf16.msra.mxu0 %v8907_v48 }
 0x1b3   : > { %6348 = vmatpush3.bf16.msra.mxu1 %v7733_v26  ;;  %6162 = vmatprep.subr.bf16.mxu0 %v8909_v57  ;;  %v2125_v26 = vsel %vm2111_vm2, %v498_v46, 0  ;;  %v8007_v7 = vand.u32 4294901760, %v7987_v0 }
 0x1b4   : > { %6350 = vmatprep.subr.bf16.mxu1 %v8908_v60  ;;  %v7998_v47 = vand.u32 4294901760, %v2125_v26 }
 0x1b5   : > { %8912 = vst [vmem:[#allocation9_spill] sm:$0xff] %v8007_v7  ;;  %v2252_v9 = vsub.f32 %v7987_v0, %v8007_v7 }
 0x1b6   : > { %6164 = vmatpush3.bf16.msra.mxu0 %v8909_v57  ;;  %v8016_v20 = vsub.f32 %v2125_v26, %v7998_v47 }
 0x1b7   : > { %6352 = vmatpush3.bf16.msra.mxu1 %v8908_v60  ;;  %6166 = vmatprep.subr.bf16.mxu0 %v7764_v18 }
 0x1b8   : > { %6354 = vmatprep.subr.bf16.mxu1 %v7758_v36 }
 0x1ba   : > { %6168 = vmatpush3.bf16.msra.mxu0 %v7764_v18  ;;  %v7990_v18 = vsub.f32 %v2122_v14, %v7977_v53 }
 0x1bb   : > { %6356 = vmatpush3.bf16.msra.mxu1 %v7758_v36  ;;  %6170 = vmatprep.subr.bf16.mxu0 %v7776_v55 }
 0x1bc   : > { %6358 = vmatprep.subr.bf16.mxu1 %v7770_v34  ;;  %v8010_v1 = vand.u32 4294901760, %v7990_v18 }
 0x1be   : > { %6172 = vmatpush3.bf16.msra.mxu0 %v7776_v55  ;;  %v2128_v55 = vsel %vm2111_vm2, %v499_v54, 0  ;;  %8913 = vst [vmem:[#allocation10_spill] sm:$0xff] %v8010_v1  ;;  %v2262_v12 = vsub.f32 %v7990_v18, %v8010_v1 }
 0x1bf   : > { %6360 = vmatpush3.bf16.msra.mxu1 %v7770_v34  ;;  %6174 = vmatprep.subr.bf16.mxu0 %v7152_v16  ;;  %v501_v34 = vld [vmem:[%s8665_s3 + $0x38] sm:$0xff]  ;;  %v8018_v24 = vand.u32 4294901760, %v2128_v55 }
 0x1c0   : > { %6362 = vmatprep.subr.bf16.mxu1 %v7778_v56  ;;  %v2134_v4 = vsel %vm2111_vm2, %v501_v34, 0 }
 0x1c1   : > { %5358 = vmatmul.mubr.f32.vlgmr.msra.gmra.mrb[0].mxu0 %v7338_v31  ;;  %v8025_v45 = vand.u32 4294901760, %v2134_v4  ;;  %v8039_v11 = vsub.f32 %v2128_v55, %v8018_v24 }
 0x1c2   : > { %6176 = vmatpush3.bf16.msra.mxu0 %v7152_v16  ;;  %5360 = vmatprep.mubr.f32.mxu0 %v7615_v40  ;;  %v494_v16 = vld [vmem:[%s8665_s3] sm:$0xff] }
 0x1c3   : > { %6364 = vmatpush3.bf16.msra.mxu1 %v7778_v56  ;;  %6178 = vmatprep.subr.bf16.mxu0 %v8890_v10  ;;  %v2131_v56 = vsel %vm2111_vm2, %v500_v35, 0  ;;  %8915 = vst [vmem:[#allocation12_spill] sm:$0xff] %v8039_v11 }
 0x1c4   : > { %6366 = vmatprep.subr.bf16.mxu1 %v8888_v21  ;;  %v8023_v3 = vand.u32 4294901760, %v2131_v56 }
 0x1c5   : > { %5361 = vmatmul.mubr.f32.gmra.mrb[2].mxu0 %v7671_v58 }
 0x1c6   : > { %5586 = vmatmul.mubr.f32.vlgmr.msra.gmra.mrb[0].mxu1 %v7338_v31  ;;  %6180 = vmatpush3.bf16.msra.mxu0 %v8890_v10  ;;  %v8042_v10 = vsub.f32 %v2131_v56, %v8023_v3 }
 0x1c7   : > { %6368 = vmatpush3.bf16.msra.mxu1 %v8888_v21  ;;  %5588 = vmatprep.mubr.f32.mxu1 %v7615_v40  ;;  %v8036_v21 = vand.u32 4294901760, %v8016_v20 }
 0x1c8   : > { %6370 = vmatprep.subr.bf16.mxu1 %v8891_v32  ;;  %6182 = vmatprep.subr.bf16.mxu0 %v8892_v13  ;;  %8916 = vst [vmem:[#allocation20_spill] sm:$0xff] %v8042_v10  ;;  %v8069_v48 = vand.u32 4294901760, %v8042_v10 }
 0x1c9   : > { %5395 = vmatprep.mubr.f32.mxu0 %v7297_v50  ;;  %8914 = vst [vmem:[#allocation11_spill] sm:$0xff] %v8036_v21 }
 0x1ca   : > { %5589 = vmatmul.mubr.f32.gmra.mrb[2].mxu1 %v7671_v58  ;;  %6184 = vmatpush3.bf16.msra.mxu0 %v8892_v13  ;;  %v8047_v13 = vand.u32 4294901760, %v2137_v25  ;;  %8919 = vst [vmem:[#allocation15_spill] sm:$0xff] %v8069_v48 }
 0x1cb   : > { %6372 = vmatpush3.bf16.msra.mxu1 %v8891_v32  ;;  %5623 = vmatprep.mubr.f32.mxu1 %v7297_v50  ;;  %v2113_v50 = vsel %vm2111_vm2, %v494_v16, 0  ;;  %v8045_v32 = vsub.f32 %v2134_v4, %v8025_v45  ;;  %v505_v16 = vld [vmem:[%s8665_s3 + $0x58] sm:$0xff] }
 0x1cc   : > { %6374 = vmatprep.subr.bf16.mxu1 %v8893_v19  ;;  %6186 = vmatprep.subr.bf16.mxu0 %v8895_v27  ;;  %v7948_v6 = vand.u32 4294901760, %v2113_v50  ;;  %v8075_v57 = vsub.f32 %v2137_v25, %v8047_v13  ;;  %v8087_v55 = vsel %vm2111_vm2, %v505_v16, 0 }
 0x1cd   : > { %8917 = vst [vmem:[#allocation13_spill] sm:$0xff] %v8045_v32  ;;  %v8072_v60 = vand.u32 4294901760, %v8045_v32 }
 0x1ce   : > { %6188 = vmatpush3.bf16.msra.mxu0 %v8895_v27  ;;  %v7951_v5 = vsub.f32 %v2113_v50, %v7948_v6  ;;  %8921 = vst [vmem:[#allocation17_spill] sm:$0xff] %v8075_v57 }
 0x1cf   : > { %6376 = vmatpush3.bf16.msra.mxu1 %v8893_v19  ;;  %6190 = vmatprep.subr.bf16.mxu0 %v8897_v49  ;;  %v504_v19 = vld [vmem:[%s8665_s3 + $0x50] sm:$0xff]  ;;  %8920 = vst [vmem:[#allocation16_spill] sm:$0xff] %v8072_v60 }
 0x1d0   : > { %6378 = vmatprep.subr.bf16.mxu1 %v8896_v30 }
 0x1d2   : > { %6192 = vmatpush3.bf16.msra.mxu0 %v8897_v49  ;;  %v8056_v49 = vand.u32 4294901760, %v2252_v9 }
 0x1d3   : > { %6380 = vmatpush3.bf16.msra.mxu1 %v8896_v30  ;;  %6194 = vmatprep.subr.bf16.mxu0 %v8899_v33 }
 0x1d4   : > { %6382 = vmatprep.subr.bf16.mxu1 %v8898_v29 }
 0x1d6   : > { %6196 = vmatpush3.bf16.msra.mxu0 %v8899_v33 }
 0x1d7   : > { %6384 = vmatpush3.bf16.msra.mxu1 %v8898_v29  ;;  %6198 = vmatprep.subr.bf16.mxu0 %v8901_v22  ;;  %v8058_v29 = vand.u32 4294901760, %v2262_v12 }
 0x1d8   : > { %6386 = vmatprep.subr.bf16.mxu1 %v8900_v37 }
 0x1da   : > { %6200 = vmatpush3.bf16.msra.mxu0 %v8901_v22 }
 0x1db   : > { %6388 = vmatpush3.bf16.msra.mxu1 %v8900_v37  ;;  %6202 = vmatprep.subr.bf16.mxu0 %v8903_v38 }
 0x1dc   : > { %6390 = vmatprep.subr.bf16.mxu1 %v8902_v23 }
 0x1de   : > { %6204 = vmatpush3.bf16.msra.mxu0 %v8903_v38  ;;  %v8063_v38 = vand.u32 4294901760, %v8039_v11 }
 0x1df   : > { %6392 = vmatpush3.bf16.msra.mxu1 %v8902_v23  ;;  %v2272_v23 = vsub.f32 %v8016_v20, %v8036_v21 }
 0x1e0   : > { %6394 = vmatprep.subr.bf16.mxu1 %v8904_v41  ;;  %8918 = vst [vmem:[#allocation14_spill] sm:$0xff] %v8063_v38 }
 0x1e1   : > { %5396 = vmatmul.mubr.f32.vlgmr.msra.gmra.mrb[0].mxu0 %v7338_v31 }
 0x1e2   : > { %5398 = vmatprep.mubr.f32.mxu0 %v7615_v40 }
 0x1e3   : > { %6396 = vmatpush3.bf16.msra.mxu1 %v8904_v41  ;;  %v8066_v41 = vsel %vm2111_vm2, %v504_v19, 0 }
 0x1e4   : > { %v8084_v14 = vand.u32 4294901760, %v8066_v41 }
 0x1e5   : > { %5399 = vmatmul.mubr.f32.gmra.mrb[2].mxu0 %v7671_v58 }
 0x1e6   : > { %5624 = vmatmul.mubr.f32.vlgmr.msra.gmra.mrb[0].mxu1 %v7338_v31  ;;  %v7954_v31 = vand.u32 4294901760, %v7951_v5 }
 0x1e7   : > { %5626 = vmatprep.mubr.f32.mxu1 %v7615_v40 }
 0x1e8   : > { %8910 = vst [vmem:[#allocation8_spill] sm:$0xff] %v7954_v31  ;;  %v2232_v40 = vsub.f32 %v7951_v5, %v7954_v31 }
 0x1ea   : > { %5627 = vmatmul.mubr.f32.gmra.mrb[2].mxu1 %v7671_v58  ;;  %v2233_v62 = vand.u32 4294901760, %v2232_v40  ;;  %v495_v58 = vld [vmem:[%s8665_s3 + $0x8] sm:$0xff] }
 0x1eb   : > { %v2116_v17 = vsel %vm2111_vm2, %v495_v58, 0  ;;  %v8081_v58 = vsub.f32 %v2140_v61, %v8052_v52 }
 0x1ec   : > { %5637 = vmatprep.mubr.f32.mxu0 %v2233_v62  ;;  %5829 = vmatprep.mubr.f32.mxu1 %v2233_v62  ;;  %v7973_v44 = vand.u32 4294901760, %v2116_v17 }
 0x1ed   : > { %8922 = vst [vmem:[#allocation18_spill] sm:$0xff] %v8081_v58 }
 0x1ee   : > { %v7984_v36 = vsub.f32 %v2116_v17, %v7973_v44 }
 0x1f0   : > { %v8004_v39 = vand.u32 4294901760, %v7984_v36 }
 0x1f2   : > { %8911 = vst [vmem:[#allocation21_spill] sm:$0xff] %v8004_v39  ;;  %v2242_v8 = vsub.f32 %v7984_v36, %v8004_v39 }
 0x1f4   : > { %v8054_v30 = vand.u32 4294901760, %v2242_v8 }
 0x2b4   : > { %v5397_v27 = vpop.f32.mrb[0].mxu0 }
 0x2b5   : > { %v2088_v33 = vmul.f32 0.0009765625, %v5397_v27  ;;  %v1278_v22 = vpop.f32.mrb[1].mxu0 }
 0x2b6   : > { %v2087_v15 = vmul.f32 0.0009765625, %v1278_v22 }
 0x2b7   : > { %v2164_v50 = vand.u32 4294901760, %v2088_v33  ;;  %v2096_v62 = vmul.f32 %v2088_v33, %v2088_v33 }
 0x2b8   : > { %v2161_v51 = vand.u32 4294901760, %v2087_v15  ;;  %v2095_v17 = vmul.f32 %v2087_v15, %v2087_v15  ;;  %v5400_v28 = vpop.f32.mrb[2].mxu0 }
 0x2b9   : > { %v5625_v37 = vpop.f32.mrb[0].mxu1  ;;  %v2398_v46 = vsub.f32 %v2088_v33, %v2164_v50  ;;  %v2090_v54 = vmul.f32 0.0009765625, %v5400_v28  ;;  %v1290_v34 = vpop.f32.mrb[3].mxu0 }
 0x2ba   : > { %v2064_v42 = vpop.f32.mrb[1].mxu1  ;;  %v2092_v40 = vmul.f32 0.0009765625, %v5625_v37  ;;  %v8089_v56 = vpack.c.bf16 %v2164_v50, %v2161_v51  ;;  %v2391_v4 = vsub.f32 %v2087_v15, %v2161_v51  ;;  %v2089_v61 = vmul.f32 0.0009765625, %v1290_v34 }
 0x2bb   : > { %v2091_v59 = vmul.f32 0.0009765625, %v2064_v42  ;;  %v2170_v9 = vand.u32 4294901760, %v2090_v54  ;;  %v2098_v12 = vmul.f32 %v2090_v54, %v2090_v54  ;;  %v2399_v37 = vand.u32 4294901760, %v2398_v46 }
 0x2bc   : > { %v2100_v26 = vsub.f32 %v2092_v40, %v2096_v62  ;;  %6398 = vmatprep.subr.bf16.mxu0 %v8089_v56  ;;  %v2392_v33 = vand.u32 4294901760, %v2391_v4  ;;  %v2167_v16 = vand.u32 4294901760, %v2089_v61  ;;  %v2097_v15 = vmul.f32 %v2089_v61, %v2089_v61 }
 0x2bd   : > { %v5628_v35 = vpop.f32.mrb[2].mxu1  ;;  %v2099_v2 = vsub.f32 %v2091_v59, %v2095_v17  ;;  %v2412_v22 = vsub.f32 %v2090_v54, %v2170_v9  ;;  %6400 = vmatpush3.bf16.msra.mxu0 %v8089_v56  ;;  %v2400_v40 = vsub.f32 %v2398_v46, %v2399_v37  ;;  %v8095_v34 = vpack.c.bf16 %v2398_v46, %v2391_v4  ;;  %v506_v54 = vld [vmem:[%s8665_s3 + $0x60] sm:$0xff]  ;;  %v507_v46 = vld [vmem:[%s8665_s3 + $0x68] sm:$0xff] }
 0x2be   : > { %v2094_v43 = vmul.f32 0.0009765625, %v5628_v35  ;;  %v2076_v25 = vpop.f32.mrb[3].mxu1  ;;  %v2104_v8 = vadd.f32 1e-05, %v2100_v26  ;;  %v2393_v50 = vsub.f32 %v2391_v4, %v2392_v33  ;;  %v8093_v51 = vpack.c.bf16 %v2170_v9, %v2167_v16 }
 0x2bf   : > { %v2103_v19 = vadd.f32 1e-05, %v2099_v2  ;;  %v2093_v27 = vmul.f32 0.0009765625, %v2076_v25  ;;  %v2405_v59 = vsub.f32 %v2089_v61, %v2167_v16  ;;  %v2413_v17 = vand.u32 4294901760, %v2412_v22 }
 0x2c0   : > { %6769 = vrsqrt.f32 %v2104_v8  ;;  %v2102_v42 = vsub.f32 %v2094_v43, %v2098_v12  ;;  %v2394_v26 = vand.u32 4294901760, %v2393_v50  ;;  %v2401_v35 = vand.u32 4294901760, %v2400_v40  ;;  %6402 = vmatprep.subr.bf16.mxu0 %v8093_v51 }
 0x2c1   : > { %6771 = vrsqrt.f32 %v2103_v19  ;;  %v2101_v28 = vsub.f32 %v2093_v27, %v2097_v15  ;;  %v2406_v2 = vand.u32 4294901760, %v2405_v59  ;;  %v2414_v43 = vsub.f32 %v2412_v22, %v2413_v17  ;;  %6404 = vmatpush3.bf16.msra.mxu0 %v8093_v51 }
 0x2c2   : > { %v2106_v62 = vadd.f32 1e-05, %v2102_v42  ;;  %v8101_v25 = vpack.c.bf16 %v2412_v22, %v2405_v59  ;;  %v6405_v9 = vpack.c.bf16 %v2401_v35, %v2394_v26  ;;  %v8105_v12 = vand.u32 4294901760, %v8075_v57 }
 0x2c3   : > { %v2105_v8 = vadd.f32 1e-05, %v2101_v28  ;;  %v8110_v4 = vpack.c.bf16 %v2399_v37, %v2392_v33  ;;  %v2407_v61 = vsub.f32 %v2405_v59, %v2406_v2  ;;  %v2415_v19 = vand.u32 4294901760, %v2414_v43  ;;  %v508_v33 = vld [vmem:[%s8665_s3 + $0x70] sm:$0xff] }
 0x2c4   : > { %6773 = vrsqrt.f32 %v2106_v62  ;;  %8923 = vst [vmem:[#allocation19_spill] sm:$0xff] %v8105_v12  ;;  %v2149_v27 = vsel %vm2111_vm2, %v506_v54, 0  ;;  %v8113_v42 = vpack.c.bf16 %v2413_v17, %v2406_v2  ;;  %6406 = vmatprep.subr.bf16.mxu0 %v6405_v9  ;;  %v2282_v22 = vsub.f32 %v8039_v11, %v8063_v38  ;;  %5638 = vmatmul.mubr.f32.vlgmr.msra.gmra.mrb[4].mxu0 %v8054_v30  ;;  %v509_v2 = vld [vmem:[%s8665_s3 + $0x78] sm:$0xff] }
 0x2c5   : > { %6775 = vrsqrt.f32 %v2105_v8  ;;  %v2292_v16 = vsub.f32 %v8042_v10, %v8069_v48  ;;  %v8120_v15 = vand.u32 4294901760, %v8087_v55  ;;  %v2408_v37 = vand.u32 4294901760, %v2407_v61  ;;  %6408 = vmatpush3.bf16.msra.mxu0 %v6405_v9  ;;  %5640 = vmatprep.mubr.f32.mxu0 %v8056_v49 }
 0x2c6   : > { %8924 = vst [vmem:[#allocation23_spill] sm:$0xff] %v8113_v42  ;;  %v2302_v50 = vsub.f32 %v8045_v32, %v8072_v60  ;;  %v8130_v40 = vsub.f32 %v8066_v41, %v8084_v14  ;;  %v2152_v62 = vsel %vm2111_vm2, %v507_v46, 0  ;;  %v8137_v59 = vand.u32 4294901760, %v2272_v23 }
 0x2c7   : > { %v8139_v17 = vand.u32 4294901760, %v2149_v27  ;;  %v6409_v26 = vpack.c.bf16 %v2415_v19, %v2408_v37  ;;  %v2312_v35 = vsub.f32 %v8075_v57, %v8105_v12  ;;  %v8144_v41 = vand.u32 4294901760, %v8081_v58 }
 0x2c8   : > { %8925 = vst [vmem:[#allocation24_spill] sm:$0xff] %v8130_v40  ;;  %v2155_v54 = vsel %vm2111_vm2, %v508_v33, 0  ;;  %v8150_v23 = vand.u32 4294901760, %v2282_v22  ;;  %v8154_v9 = vsub.f32 %v8087_v55, %v8120_v15  ;;  %v8156_v46 = vand.u32 4294901760, %v2152_v62  ;;  %5641 = vmatmul.mubr.f32.gmra.mrb[6].mxu0 %v8058_v29 }
 0x2c9   : > { %8926 = vst [vmem:[#allocation25_spill] sm:$0xff] %v8144_v41  ;;  %6410 = vmatprep.subr.bf16.mxu0 %v6409_v26  ;;  %v8159_v19 = vand.u32 4294901760, %v2292_v16  ;;  %v8161_v33 = vand.u32 4294901760, %v2302_v50  ;;  %v8164_v37 = vand.u32 4294901760, %v8130_v40  ;;  %5643 = vmatprep.mubr.f32.mxu0 %v8137_v59  ;;  %v8168_v55 = vsub.f32 %v2149_v27, %v8139_v17 }
 0x2ca   : > { %v6770_v28 = vpop.eup %6769  ;;  %6412 = vmatpush3.bf16.msra.mxu0 %v6409_v26  ;;  %v8170_v12 = vand.u32 4294901760, %v2155_v54  ;;  %v2158_v60 = vsel %vm2111_vm2, %v509_v2, 0  ;;  %v8176_v16 = vand.u32 4294901760, %v2312_v35  ;;  %v2322_v50 = vsub.f32 %v8081_v58, %v8144_v41 }
 0x2cb   : > { %v6772_v43 = vpop.eup %6771  ;;  %v3294_v8 = vand.u32 4294901760, %v6770_v28  ;;  %8927 = vst [vmem:[#allocation22_spill] sm:$0xff] %v8164_v37  ;;  %6414 = vmatprep.subr.bf16.mxu0 %v8095_v34  ;;  %v8181_v27 = vand.u32 4294901760, %v8154_v9  ;;  %v8184_v1 = vsub.f32 %v2152_v62, %v8156_v46  ;;  %v2332_v35 = vsub.f32 %v8130_v40, %v8164_v37 }
 0x2cc   : > { %v3291_v61 = vand.u32 4294901760, %v6772_v43  ;;  %5644 = vmatmul.mubr.f32.gmra.mrb[8].mxu0 %v8150_v23  ;;  %v8192_v41 = vand.u32 4294901760, %v2158_v60  ;;  %v8197_v42 = vand.u32 4294901760, %v8168_v55  ;;  %v8200_v7 = vsub.f32 %v2155_v54, %v8170_v12 }
 0x2cd   : > { %v3528_v22 = vsub.f32 %v6770_v28, %v3294_v8  ;;  %8928 = vst [vmem:[#allocation26_spill] sm:$0xff] %v8181_v27  ;;  %5646 = vmatprep.mubr.f32.mxu0 %v8159_v19  ;;  %v2323_v31 = vand.u32 4294901760, %v2322_v50  ;;  %v2342_v57 = vsub.f32 %v8154_v9, %v8181_v27  ;;  %v8207_v10 = vand.u32 4294901760, %v8184_v1 }
 0x2ce   : > { %v6774_v48 = vpop.eup %6773  ;;  %v8173_v38 = vpack.c.bf16 %v3294_v8, %v3291_v61  ;;  %v3521_v26 = vsub.f32 %v6772_v43, %v3291_v61  ;;  %8929 = vst [vmem:[#allocation27_spill] sm:$0xff] %v8197_v42  ;;  %v8213_v11 = vsub.f32 %v2158_v60, %v8192_v41  ;;  %v2333_v50 = vand.u32 4294901760, %v2332_v35 }
 0x2cf   : > { %v3300_v21 = vand.u32 4294901760, %v6774_v48  ;;  %v3529_v28 = vand.u32 4294901760, %v3528_v22  ;;  %v6776_v43 = vpop.eup %6775  ;;  %v2362_v60 = vsub.f32 %v8184_v1, %v8207_v10 }
 0x2d0   : > { %6446 = vmatprep.subr.bf16.mxu1 %v8173_v38  ;;  %v3522_v2 = vand.u32 4294901760, %v3521_v26  ;;  %v8190_v8 = vpack.c.bf16 %v3528_v22, %v3521_v26  ;;  %v3297_v39 = vand.u32 4294901760, %v6776_v43  ;;  %5647 = vmatmul.mubr.f32.gmra.mrb[10].mxu0 %v8161_v33 }
 0x2d1   : > { %6448 = vmatpush3.bf16.msra.mxu1 %v8173_v38  ;;  %v3530_v61 = vsub.f32 %v3528_v22, %v3529_v28  ;;  %v3542_v62 = vsub.f32 %v6774_v48, %v3300_v21  ;;  %5649 = vmatprep.mubr.f32.mxu0 %v8176_v16 }
 0x2d2   : > { %v3523_v37 = vsub.f32 %v3521_v26, %v3522_v2  ;;  %v8202_v40 = vpack.c.bf16 %v3529_v28, %v3522_v2  ;;  %v8209_v48 = vpack.c.bf16 %v3300_v21, %v3297_v39  ;;  %v3535_v54 = vsub.f32 %v6776_v43, %v3297_v39 }
 0x2d3   : > { %v3531_v58 = vand.u32 4294901760, %v3530_v61  ;;  %v3543_v32 = vand.u32 4294901760, %v3542_v62  ;;  %v2352_v28 = vsub.f32 %v8168_v55, %v8197_v42  ;;  %v8219_v2 = vand.u32 4294901760, %v8200_v7 }
 0x2d4   : > { %v3524_v22 = vand.u32 4294901760, %v3523_v37  ;;  %6450 = vmatprep.subr.bf16.mxu1 %v8209_v48  ;;  %v3536_v61 = vand.u32 4294901760, %v3535_v54  ;;  %v8222_v27 = vpack.c.bf16 %v3542_v62, %v3535_v54  ;;  %v2343_v39 = vand.u32 4294901760, %v2342_v57  ;;  %5650 = vmatmul.mubr.f32.gmra.mrb[12].mxu0 %v2323_v31 }
 0x2d5   : > { %v3544_v26 = vsub.f32 %v3542_v62, %v3543_v32  ;;  %6452 = vmatpush3.bf16.msra.mxu1 %v8209_v48  ;;  %v8228_v43 = vand.u32 4294901760, %v8213_v11  ;;  %5652 = vmatprep.mubr.f32.mxu0 %v2333_v50  ;;  %v2372_v62 = vsub.f32 %v8200_v7, %v8219_v2 }
 0x2d6   : > { %v6453_v21 = vpack.c.bf16 %v3531_v58, %v3524_v22  ;;  %v3537_v37 = vsub.f32 %v3535_v54, %v3536_v61  ;;  %v8230_v42 = vpack.c.bf16 %v3543_v32, %v3536_v61  ;;  %v2353_v58 = vand.u32 4294901760, %v2352_v28  ;;  %v4452_v61 = vld [vmem:[%s8664_s2] sm:$0xff] }
 0x2d7   : > { %v3545_v35 = vand.u32 4294901760, %v3544_v26  ;;  %v2363_v54 = vand.u32 4294901760, %v2362_v60  ;;  %v2382_v26 = vsub.f32 %v8213_v11, %v8228_v43  ;;  %v2373_v32 = vand.u32 4294901760, %v2372_v62 }
 0x2d8   : > { %6454 = vmatprep.subr.bf16.mxu1 %v6453_v21  ;;  %5830 = vmatmul.mubr.f32.vlgmr.msra.gmra.mrb[4].mxu1 %v8054_v30  ;;  %v3538_v57 = vand.u32 4294901760, %v3537_v37 }
 0x2d9   : > { %6456 = vmatpush3.bf16.msra.mxu1 %v6453_v21  ;;  %5832 = vmatprep.mubr.f32.mxu1 %v8056_v49  ;;  %v2383_v30 = vand.u32 4294901760, %v2382_v26  ;;  %v8931_v49 = vld [vmem:[#allocation20_spill] sm:$0xff]  ;;  %v4425_v21 = vld [vmem:[%s8663_s1 + $0x28] sm:$0xff] }
 0x2da   : > { %5653 = vmatmul.mubr.f32.gmra.mrb[14].mxu0 %v2343_v39  ;;  %v6457_v22 = vpack.c.bf16 %v3545_v35, %v3538_v57  ;;  %v4424_v35 = vld [vmem:[%s8663_s1 + $0x20] sm:$0xff] }
 0x2db   : > { %5655 = vmatprep.mubr.f32.mxu0 %v2353_v58 }
 0x2dc   : > { %5833 = vmatmul.mubr.f32.gmra.mrb[6].mxu1 %v8058_v29  ;;  %6458 = vmatprep.subr.bf16.mxu1 %v6457_v22  ;;  %v8932_v29 = vld [vmem:[#allocation13_spill] sm:$0xff] }
 0x2dd   : > { %6460 = vmatpush3.bf16.msra.mxu1 %v6457_v22  ;;  %5835 = vmatprep.mubr.f32.mxu1 %v8137_v59  ;;  %v8935_v59 = vld [vmem:[#allocation24_spill] sm:$0xff] }
 0x2de   : > { %6462 = vmatprep.subr.bf16.mxu1 %v8190_v8  ;;  %5656 = vmatmul.mubr.f32.gmra.mrb[16].mxu0 %v2363_v54 }
 0x2df   : > { %5658 = vmatprep.mubr.f32.mxu0 %v2373_v32 }
 0x2e0   : > { %5836 = vmatmul.mubr.f32.gmra.mrb[8].mxu1 %v8150_v23  ;;  %v8941_v23 = vld [vmem:[#allocation11_spill] sm:$0xff] }
 0x2e1   : > { %5838 = vmatprep.mubr.f32.mxu1 %v8159_v19  ;;  %v8943_v19 = vld [vmem:[#allocation15_spill] sm:$0xff] }
 0x2e2   : > { %5659 = vmatmul.mubr.f32.gmra.mrb[18].mxu0 %v2383_v30 }
 0x2e3   : > { %5669 = vmatprep.mubr.f32.mxu0 %v7948_v6 }
 0x2e4   : > { %5839 = vmatmul.mubr.f32.gmra.mrb[10].mxu1 %v8161_v33  ;;  %v8944_v33 = vld [vmem:[#allocation16_spill] sm:$0xff] }
 0x2e5   : > { %5841 = vmatprep.mubr.f32.mxu1 %v8176_v16  ;;  %v8945_v16 = vld [vmem:[#allocation19_spill] sm:$0xff] }
 0x2e6   : > { %5670 = vmatmul.mubr.f32.vlgmr.msra.gmra.mrb[4].mxu0 %v7973_v44 }
 0x2e7   : > { %6416 = vmatpush3.bf16.msra.mxu0 %v8095_v34  ;;  %5672 = vmatprep.mubr.f32.mxu0 %v7975_v63  ;;  %v8933_v34 = vld [vmem:[#allocation17_spill] sm:$0xff] }
 0x2e8   : > { %6418 = vmatprep.subr.bf16.mxu0 %v8101_v25  ;;  %5842 = vmatmul.mubr.f32.gmra.mrb[12].mxu1 %v2323_v31  ;;  %v8930_v31 = vld [vmem:[#allocation12_spill] sm:$0xff] }
 0x2e9   : > { %5844 = vmatprep.mubr.f32.mxu1 %v2333_v50 }
 0x2ea   : > { %5673 = vmatmul.mubr.f32.gmra.mrb[6].mxu0 %v7977_v53 }
 0x2eb   : > { %6420 = vmatpush3.bf16.msra.mxu0 %v8101_v25  ;;  %5675 = vmatprep.mubr.f32.mxu0 %v7998_v47  ;;  %v8934_v25 = vld [vmem:[#allocation18_spill] sm:$0xff] }
 0x2ec   : > { %6422 = vmatprep.subr.bf16.mxu0 %v8089_v56  ;;  %5845 = vmatmul.mubr.f32.gmra.mrb[14].mxu1 %v2343_v39  ;;  %v4455_v39 = vld [vmem:[%s8664_s2 + $0x18] sm:$0xff] }
 0x2ed   : > { %5847 = vmatprep.mubr.f32.mxu1 %v2353_v58 }
 0x2ee   : > { %5676 = vmatmul.mubr.f32.gmra.mrb[8].mxu0 %v8018_v24 }
 0x2ef   : > { %5678 = vmatprep.mubr.f32.mxu0 %v8023_v3 }
 0x2f0   : > { %5848 = vmatmul.mubr.f32.gmra.mrb[16].mxu1 %v2363_v54 }
 0x2f1   : > { %5850 = vmatprep.mubr.f32.mxu1 %v2373_v32 }
 0x2f2   : > { %5679 = vmatmul.mubr.f32.gmra.mrb[10].mxu0 %v8025_v45 }
 0x2f3   : > { %5681 = vmatprep.mubr.f32.mxu0 %v8047_v13 }
 0x2f4   : > { %5851 = vmatmul.mubr.f32.gmra.mrb[18].mxu1 %v2383_v30  ;;  %v4427_v30 = vld [vmem:[%s8663_s1 + $0x38] sm:$0xff] }
 0x2f5   : > { %5861 = vmatprep.mubr.f32.mxu1 %v7948_v6 }
 0x2f6   : > { %5682 = vmatmul.mubr.f32.gmra.mrb[12].mxu0 %v8052_v52 }
 0x2f7   : > { %5684 = vmatprep.mubr.f32.mxu0 %v8084_v14 }
 0x2f8   : > { %5862 = vmatmul.mubr.f32.vlgmr.msra.gmra.mrb[4].mxu1 %v7973_v44 }
 0x2f9   : > { %6464 = vmatpush3.bf16.msra.mxu1 %v8190_v8  ;;  %5864 = vmatprep.mubr.f32.mxu1 %v7975_v63 }
 0x2fa   : > { %6466 = vmatprep.subr.bf16.mxu1 %v8222_v27  ;;  %5685 = vmatmul.mubr.f32.gmra.mrb[14].mxu0 %v8120_v15 }
 0x2fb   : > { %5687 = vmatprep.mubr.f32.mxu0 %v8139_v17 }
 0x2fc   : > { %5865 = vmatmul.mubr.f32.gmra.mrb[6].mxu1 %v7977_v53 }
 0x2fd   : > { %6468 = vmatpush3.bf16.msra.mxu1 %v8222_v27  ;;  %5867 = vmatprep.mubr.f32.mxu1 %v7998_v47  ;;  %v8946_v27 = vld [vmem:[#allocation25_spill] sm:$0xff] }
 0x2fe   : > { %6470 = vmatprep.subr.bf16.mxu1 %v8173_v38  ;;  %5688 = vmatmul.mubr.f32.gmra.mrb[16].mxu0 %v8156_v46 }
 0x2ff   : > { %5690 = vmatprep.mubr.f32.mxu0 %v8170_v12 }
 0x300   : > { %5868 = vmatmul.mubr.f32.gmra.mrb[8].mxu1 %v8018_v24 }
 0x301   : > { %5870 = vmatprep.mubr.f32.mxu1 %v8023_v3 }
 0x302   : > { %5691 = vmatmul.mubr.f32.gmra.mrb[18].mxu0 %v8192_v41 }
 0x303   : > { %5701 = vmatprep.mubr.f32.mxu0 %v7951_v5 }
 0x304   : > { %5871 = vmatmul.mubr.f32.gmra.mrb[10].mxu1 %v8025_v45 }
 0x305   : > { %5873 = vmatprep.mubr.f32.mxu1 %v8047_v13 }
 0x306   : > { %5702 = vmatmul.mubr.f32.vlgmr.msra.gmra.mrb[4].mxu0 %v7984_v36 }
 0x307   : > { %6424 = vmatpush3.bf16.msra.mxu0 %v8089_v56  ;;  %5704 = vmatprep.mubr.f32.mxu0 %v7987_v0 }
 0x308   : > { %6426 = vmatprep.subr.bf16.mxu0 %v8093_v51  ;;  %5874 = vmatmul.mubr.f32.gmra.mrb[12].mxu1 %v8052_v52 }
 0x309   : > { %5876 = vmatprep.mubr.f32.mxu1 %v8084_v14 }
 0x30a   : > { %5705 = vmatmul.mubr.f32.gmra.mrb[6].mxu0 %v7990_v18 }
 0x30b   : > { %6428 = vmatpush3.bf16.msra.mxu0 %v8093_v51  ;;  %5707 = vmatprep.mubr.f32.mxu0 %v8016_v20 }
 0x30c   : > { %6430 = vmatprep.subr.bf16.mxu0 %v8110_v4  ;;  %5877 = vmatmul.mubr.f32.gmra.mrb[14].mxu1 %v8120_v15 }
 0x30d   : > { %5879 = vmatprep.mubr.f32.mxu1 %v8139_v17 }
 0x30e   : > { %5708 = vmatmul.mubr.f32.gmra.mrb[8].mxu0 %v8930_v31 }
 0x30f   : > { %5710 = vmatprep.mubr.f32.mxu0 %v8931_v49 }
 0x310   : > { %5880 = vmatmul.mubr.f32.gmra.mrb[16].mxu1 %v8156_v46 }
 0x311   : > { %5882 = vmatprep.mubr.f32.mxu1 %v8170_v12 }
 0x312   : > { %5711 = vmatmul.mubr.f32.gmra.mrb[10].mxu0 %v8932_v29 }
 0x313   : > { %5713 = vmatprep.mubr.f32.mxu0 %v8933_v34 }
 0x314   : > { %5883 = vmatmul.mubr.f32.gmra.mrb[18].mxu1 %v8192_v41 }
 0x315   : > { %5893 = vmatprep.mubr.f32.mxu1 %v7951_v5  ;;  %v8936_v5 = vld [vmem:[#allocation8_spill] sm:$0xff] }
 0x316   : > { %5714 = vmatmul.mubr.f32.gmra.mrb[12].mxu0 %v8934_v25 }
 0x317   : > { %5716 = vmatprep.mubr.f32.mxu0 %v8935_v59 }
 0x318   : > { %5894 = vmatmul.mubr.f32.vlgmr.msra.gmra.mrb[4].mxu1 %v7984_v36  ;;  %v8937_v36 = vld [vmem:[#allocation21_spill] sm:$0xff] }
 0x319   : > { %6472 = vmatpush3.bf16.msra.mxu1 %v8173_v38  ;;  %5896 = vmatprep.mubr.f32.mxu1 %v7987_v0  ;;  %v8938_v0 = vld [vmem:[#allocation9_spill] sm:$0xff] }
 0x31a   : > { %6474 = vmatprep.subr.bf16.mxu1 %v8209_v48  ;;  %5717 = vmatmul.mubr.f32.gmra.mrb[14].mxu0 %v8154_v9 }
 0x31b   : > { %5719 = vmatprep.mubr.f32.mxu0 %v8168_v55 }
 0x31c   : > { %5897 = vmatmul.mubr.f32.gmra.mrb[6].mxu1 %v7990_v18  ;;  %v8939_v18 = vld [vmem:[#allocation23_spill] sm:$0xff] }
 0x31d   : > { %6476 = vmatpush3.bf16.msra.mxu1 %v8209_v48  ;;  %5899 = vmatprep.mubr.f32.mxu1 %v8016_v20  ;;  %v8940_v20 = vld [vmem:[#allocation10_spill] sm:$0xff] }
 0x31e   : > { %6478 = vmatprep.subr.bf16.mxu1 %v8202_v40  ;;  %5720 = vmatmul.mubr.f32.gmra.mrb[16].mxu0 %v8184_v1 }
 0x31f   : > { %5722 = vmatprep.mubr.f32.mxu0 %v8200_v7 }
 0x320   : > { %5900 = vmatmul.mubr.f32.gmra.mrb[8].mxu1 %v8930_v31  ;;  %v4454_v31 = vld [vmem:[%s8664_s2 + $0x10] sm:$0xff] }
 0x321   : > { %5902 = vmatprep.mubr.f32.mxu1 %v8931_v49 }
 0x322   : > { %5723 = vmatmul.mubr.f32.gmra.mrb[18].mxu0 %v8213_v11 }
 0x323   : > { %5733 = vmatprep.mubr.f32.mxu0 %v8936_v5 }
 0x324   : > { %5903 = vmatmul.mubr.f32.gmra.mrb[10].mxu1 %v8932_v29 }
 0x325   : > { %5905 = vmatprep.mubr.f32.mxu1 %v8933_v34  ;;  %v4426_v34 = vld [vmem:[%s8663_s1 + $0x30] sm:$0xff] }
 0x326   : > { %5734 = vmatmul.mubr.f32.vlgmr.msra.gmra.mrb[4].mxu0 %v8937_v36 }
 0x327   : > { %6432 = vmatpush3.bf16.msra.mxu0 %v8110_v4  ;;  %5736 = vmatprep.mubr.f32.mxu0 %v8938_v0  ;;  %v8942_v4 = vld [vmem:[#allocation14_spill] sm:$0xff] }
 0x328   : > { %6434 = vmatprep.subr.bf16.mxu0 %v8939_v18  ;;  %5906 = vmatmul.mubr.f32.gmra.mrb[12].mxu1 %v8934_v25  ;;  %v4456_v25 = vld [vmem:[%s8664_s2 + $0x20] sm:$0xff] }
 0x329   : > { %5908 = vmatprep.mubr.f32.mxu1 %v8935_v59 }
 0x32a   : > { %5737 = vmatmul.mubr.f32.gmra.mrb[6].mxu0 %v8940_v20 }
 0x32b   : > { %6436 = vmatpush3.bf16.msra.mxu0 %v8939_v18  ;;  %5739 = vmatprep.mubr.f32.mxu0 %v8941_v23 }
 0x32c   : > { %6438 = vmatprep.subr.bf16.mxu0 %v8089_v56  ;;  %5909 = vmatmul.mubr.f32.gmra.mrb[14].mxu1 %v8154_v9  ;;  %v8947_v9 = vld [vmem:[#allocation22_spill] sm:$0xff] }
 0x32d   : > { %5911 = vmatprep.mubr.f32.mxu1 %v8168_v55 }
 0x32e   : > { %5740 = vmatmul.mubr.f32.gmra.mrb[8].mxu0 %v8942_v4 }
 0x32f   : > { %5742 = vmatprep.mubr.f32.mxu0 %v8943_v19 }
 0x330   : > { %5912 = vmatmul.mubr.f32.gmra.mrb[16].mxu1 %v8184_v1  ;;  %v8949_v1 = vld [vmem:[#allocation27_spill] sm:$0xff] }
 0x331   : > { %5914 = vmatprep.mubr.f32.mxu1 %v8200_v7  ;;  %v8948_v7 = vld [vmem:[#allocation26_spill] sm:$0xff] }
 0x332   : > { %5743 = vmatmul.mubr.f32.gmra.mrb[10].mxu0 %v8944_v33 }
 0x333   : > { %5745 = vmatprep.mubr.f32.mxu0 %v8945_v16 }
 0x334   : > { %5915 = vmatmul.mubr.f32.gmra.mrb[18].mxu1 %v8213_v11 }
 0x335   : > { %5925 = vmatprep.mubr.f32.mxu1 %v8936_v5 }
 0x336   : > { %5746 = vmatmul.mubr.f32.gmra.mrb[12].mxu0 %v8946_v27 }
 0x337   : > { %5748 = vmatprep.mubr.f32.mxu0 %v8947_v9 }
 0x338   : > { %5926 = vmatmul.mubr.f32.vlgmr.msra.gmra.mrb[4].mxu1 %v8937_v36 }
 0x339   : > { %6480 = vmatpush3.bf16.msra.mxu1 %v8202_v40  ;;  %5928 = vmatprep.mubr.f32.mxu1 %v8938_v0 }
 0x33a   : > { %6482 = vmatprep.subr.bf16.mxu1 %v8230_v42  ;;  %5749 = vmatmul.mubr.f32.gmra.mrb[14].mxu0 %v8948_v7 }
 0x33b   : > { %5751 = vmatprep.mubr.f32.mxu0 %v8949_v1 }
 0x33c   : > { %5929 = vmatmul.mubr.f32.gmra.mrb[6].mxu1 %v8940_v20 }
 0x33d   : > { %6484 = vmatpush3.bf16.msra.mxu1 %v8230_v42  ;;  %5931 = vmatprep.mubr.f32.mxu1 %v8941_v23  ;;  %v4423_v42 = vld [vmem:[%s8663_s1 + $0x18] sm:$0xff]  ;;  %v4429_v23 = vld [vmem:[%s8663_s1 + $0x48] sm:$0xff] }
 0x33e   : > { %6486 = vmatprep.subr.bf16.mxu1 %v8173_v38  ;;  %5752 = vmatmul.mubr.f32.gmra.mrb[16].mxu0 %v8207_v10 }
 0x33f   : > { %5754 = vmatprep.mubr.f32.mxu0 %v8219_v2 }
 0x340   : > { %5932 = vmatmul.mubr.f32.gmra.mrb[8].mxu1 %v8942_v4 }
 0x341   : > { %5934 = vmatprep.mubr.f32.mxu1 %v8943_v19  ;;  %v4457_v19 = vld [vmem:[%s8664_s2 + $0x28] sm:$0xff] }
 0x342   : > { %5755 = vmatmul.mubr.f32.gmra.mrb[18].mxu0 %v8228_v43 }
 0x343   : > { %5765 = vmatprep.mubr.f32.mxu0 %v7948_v6 }
 0x344   : > { %5935 = vmatmul.mubr.f32.gmra.mrb[10].mxu1 %v8944_v33 }
 0x345   : > { %5937 = vmatprep.mubr.f32.mxu1 %v8945_v16  ;;  %v4428_v16 = vld [vmem:[%s8663_s1 + $0x40] sm:$0xff] }
 0x346   : > { %5766 = vmatmul.mubr.f32.vlgmr.msra.gmra.mrb[4].mxu0 %v7973_v44 }
 0x347   : > { %6440 = vmatpush3.bf16.msra.mxu0 %v8089_v56  ;;  %5768 = vmatprep.mubr.f32.mxu0 %v7975_v63 }
 0x348   : > { %6442 = vmatprep.subr.bf16.mxu0 %v8093_v51  ;;  %5938 = vmatmul.mubr.f32.gmra.mrb[12].mxu1 %v8946_v27  ;;  %v4458_v27 = vld [vmem:[%s8664_s2 + $0x30] sm:$0xff] }
 0x349   : > { %5940 = vmatprep.mubr.f32.mxu1 %v8947_v9 }
 0x34a   : > { %5769 = vmatmul.mubr.f32.gmra.mrb[6].mxu0 %v7977_v53 }
 0x34b   : > { %6444 = vmatpush3.bf16.msra.mxu0 %v8093_v51  ;;  %5771 = vmatprep.mubr.f32.mxu0 %v7998_v47 }
 0x34c   : > { %5941 = vmatmul.mubr.f32.gmra.mrb[14].mxu1 %v8948_v7 }
 0x34d   : > { %5943 = vmatprep.mubr.f32.mxu1 %v8949_v1 }
 0x34e   : > { %5772 = vmatmul.mubr.f32.gmra.mrb[8].mxu0 %v8018_v24 }
 0x34f   : > { %5774 = vmatprep.mubr.f32.mxu0 %v8023_v3 }
 0x350   : > { %5944 = vmatmul.mubr.f32.gmra.mrb[16].mxu1 %v8207_v10  ;;  %v4421_v10 = vld [vmem:[%s8663_s1 + $0x8] sm:$0xff] }
 0x351   : > { %5946 = vmatprep.mubr.f32.mxu1 %v8219_v2 }
 0x352   : > { %5775 = vmatmul.mubr.f32.gmra.mrb[10].mxu0 %v8025_v45 }
 0x353   : > { %5777 = vmatprep.mubr.f32.mxu0 %v8047_v13 }
 0x354   : > { %5947 = vmatmul.mubr.f32.gmra.mrb[18].mxu1 %v8228_v43 }
 0x355   : > { %5957 = vmatprep.mubr.f32.mxu1 %v7948_v6 }
 0x356   : > { %5778 = vmatmul.mubr.f32.gmra.mrb[12].mxu0 %v8052_v52 }
 0x357   : > { %5780 = vmatprep.mubr.f32.mxu0 %v8084_v14 }
 0x358   : > { %5958 = vmatmul.mubr.f32.vlgmr.msra.gmra.mrb[4].mxu1 %v7973_v44 }
 0x359   : > { %6488 = vmatpush3.bf16.msra.mxu1 %v8173_v38  ;;  %5960 = vmatprep.mubr.f32.mxu1 %v7975_v63 }
 0x35a   : > { %6490 = vmatprep.subr.bf16.mxu1 %v8209_v48  ;;  %5781 = vmatmul.mubr.f32.gmra.mrb[14].mxu0 %v8120_v15 }
 0x35b   : > { %5783 = vmatprep.mubr.f32.mxu0 %v8139_v17 }
 0x35c   : > { %5961 = vmatmul.mubr.f32.gmra.mrb[6].mxu1 %v7977_v53 }
 0x35d   : > { %6492 = vmatpush3.bf16.msra.mxu1 %v8209_v48  ;;  %5963 = vmatprep.mubr.f32.mxu1 %v7998_v47 }
 0x35e   : > { %5784 = vmatmul.mubr.f32.gmra.mrb[16].mxu0 %v8156_v46 }
 0x35f   : > { %5786 = vmatprep.mubr.f32.mxu0 %v8170_v12 }
 0x360   : > { %5964 = vmatmul.mubr.f32.gmra.mrb[8].mxu1 %v8018_v24 }
 0x361   : > { %5966 = vmatprep.mubr.f32.mxu1 %v8023_v3 }
 0x362   : > { %5787 = vmatmul.mubr.f32.gmra.mrb[18].mxu0 %v8192_v41 }
 0x363   : > { %5797 = vmatprep.mubr.f32.mxu0 %v7948_v6 }
 0x364   : > { %5967 = vmatmul.mubr.f32.gmra.mrb[10].mxu1 %v8025_v45 }
 0x365   : > { %5969 = vmatprep.mubr.f32.mxu1 %v8047_v13 }
 0x366   : > { %5798 = vmatmul.mubr.f32.vlgmr.msra.gmra.mrb[4].mxu0 %v7973_v44 }
 0x367   : > { %5800 = vmatprep.mubr.f32.mxu0 %v7975_v63 }
 0x368   : > { %5970 = vmatmul.mubr.f32.gmra.mrb[12].mxu1 %v8052_v52 }
 0x369   : > { %5972 = vmatprep.mubr.f32.mxu1 %v8084_v14 }
 0x36a   : > { %5801 = vmatmul.mubr.f32.gmra.mrb[6].mxu0 %v7977_v53 }
 0x36b   : > { %5803 = vmatprep.mubr.f32.mxu0 %v7998_v47 }
 0x36c   : > { %5973 = vmatmul.mubr.f32.gmra.mrb[14].mxu1 %v8120_v15 }
 0x36d   : > { %5975 = vmatprep.mubr.f32.mxu1 %v8139_v17 }
 0x36e   : > { %5804 = vmatmul.mubr.f32.gmra.mrb[8].mxu0 %v8018_v24 }
 0x36f   : > { %5806 = vmatprep.mubr.f32.mxu0 %v8023_v3 }
 0x370   : > { %5976 = vmatmul.mubr.f32.gmra.mrb[16].mxu1 %v8156_v46 }
 0x371   : > { %5978 = vmatprep.mubr.f32.mxu1 %v8170_v12 }
 0x372   : > { %5807 = vmatmul.mubr.f32.gmra.mrb[10].mxu0 %v8025_v45 }
 0x373   : > { %5809 = vmatprep.mubr.f32.mxu0 %v8047_v13 }
 0x374   : > { %5979 = vmatmul.mubr.f32.gmra.mrb[18].mxu1 %v8192_v41 }
 0x375   : > { %5989 = vmatprep.mubr.f32.mxu1 %v7948_v6 }
 0x376   : > { %5810 = vmatmul.mubr.f32.gmra.mrb[12].mxu0 %v8052_v52 }
 0x377   : > { %5812 = vmatprep.mubr.f32.mxu0 %v8084_v14 }
 0x378   : > { %5990 = vmatmul.mubr.f32.vlgmr.msra.gmra.mrb[4].mxu1 %v7973_v44 }
 0x379   : > { %5992 = vmatprep.mubr.f32.mxu1 %v7975_v63 }
 0x37a   : > { %5813 = vmatmul.mubr.f32.gmra.mrb[14].mxu0 %v8120_v15 }
 0x37b   : > { %5815 = vmatprep.mubr.f32.mxu0 %v8139_v17 }
 0x37c   : > { %5993 = vmatmul.mubr.f32.gmra.mrb[6].mxu1 %v7977_v53 }
 0x37d   : > { %5995 = vmatprep.mubr.f32.mxu1 %v7998_v47 }
 0x37e   : > { %5816 = vmatmul.mubr.f32.gmra.mrb[16].mxu0 %v8156_v46 }
 0x37f   : > { %5818 = vmatprep.mubr.f32.mxu0 %v8170_v12 }
 0x380   : > { %5996 = vmatmul.mubr.f32.gmra.mrb[8].mxu1 %v8018_v24 }
 0x381   : > { %5998 = vmatprep.mubr.f32.mxu1 %v8023_v3 }
 0x382   : > { %5819 = vmatmul.mubr.f32.gmra.mrb[18].mxu0 %v8192_v41 }
 0x384   : > { %5999 = vmatmul.mubr.f32.gmra.mrb[10].mxu1 %v8025_v45 }
 0x385   : > { %6001 = vmatprep.mubr.f32.mxu1 %v8047_v13 }
 0x388   : > { %6002 = vmatmul.mubr.f32.gmra.mrb[12].mxu1 %v8052_v52  ;;  %v4420_v52 = vld [vmem:[%s8663_s1] sm:$0xff] }
 0x389   : > { %6004 = vmatprep.mubr.f32.mxu1 %v8084_v14 }
 0x38c   : > { %6005 = vmatmul.mubr.f32.gmra.mrb[14].mxu1 %v8120_v15  ;;  %v4453_v15 = vld [vmem:[%s8664_s2 + $0x8] sm:$0xff] }
 0x38d   : > { %6007 = vmatprep.mubr.f32.mxu1 %v8139_v17 }
 0x390   : > { %6008 = vmatmul.mubr.f32.gmra.mrb[16].mxu1 %v8156_v46 }
 0x391   : > { %6010 = vmatprep.mubr.f32.mxu1 %v8170_v12 }
 0x394   : > { %6011 = vmatmul.mubr.f32.gmra.mrb[18].mxu1 %v8192_v41  ;;  %v4422_v41 = vld [vmem:[%s8663_s1 + $0x10] sm:$0xff] }
 0x439   : > { %v5799_v6 = vpop.f32.mrb[4].mxu0 }
 0x43a   : > { %v3196_v44 = vpop.f32.mrb[5].mxu0 }
 0x43d   : > { %v5802_v63 = vpop.f32.mrb[6].mxu0 }
 0x43e   : > { %v3208_v53 = vpop.f32.mrb[7].mxu0 }
 0x441   : > { %v5805_v47 = vpop.f32.mrb[8].mxu0 }
 0x442   : > { %v3220_v24 = vpop.f32.mrb[9].mxu0 }
 0x445   : > { %v5808_v3 = vpop.f32.mrb[10].mxu0 }
 0x446   : > { %v8435_v45 = vpop.f32.mrb[11].mxu0 }
 0x449   : > { %v8437_v11 = vpop.f32.mrb[12].mxu0 }
 0x44a   : > { %v8442_v13 = vpop.f32.mrb[13].mxu0 }
 0x44b   : > { %v5991_v38 = vpop.f32.mrb[4].mxu1 }
 0x44c   : > { %v4437_v14 = vmul.f32 %v5991_v38, %v4421_v10  ;;  %v4326_v56 = vpop.f32.mrb[5].mxu1  ;;  %v4460_v10 = vld [vmem:[%s8664_s2 + $0x40] sm:$0xff] }
 0x44d   : > { %v4436_v51 = vmul.f32 %v4420_v52, %v4326_v56  ;;  %v8447_v12 = vpop.f32.mrb[14].mxu0 }
 0x44e   : > { %v4469_v40 = vmul.f32 %v5799_v6, %v4437_v14  ;;  %4501 = vst.msk [vmem:[%s7040_s30 + $0x8] sm:$0xff] %vm377_vm1, %v4437_v14  ;;  %v8457_v17 = vpop.f32.mrb[15].mxu0 }
 0x44f   : > { %v4468_v46 = vmul.f32 %v4436_v51, %v3196_v44  ;;  %4500 = vst.msk [vmem:[%s7040_s30] sm:$0xff] %vm377_vm1, %v4436_v51  ;;  %v5994_v55 = vpop.f32.mrb[6].mxu1 }
 0x450   : > { %v4439_v8 = vmul.f32 %v5994_v55, %v4423_v42  ;;  %v4338_v48 = vpop.f32.mrb[7].mxu1  ;;  %v4485_v50 = vsub.f32 %v4453_v15, %v4469_v40  ;;  %v4433_v42 = vld [vmem:[%s8663_s1 + $0x68] sm:$0xff] }
 0x451   : > { %v4438_v28 = vmul.f32 %v4422_v41, %v4338_v48  ;;  %v8464_v2 = vpop.f32.mrb[16].mxu0  ;;  %v4484_v22 = vsub.f32 %v4452_v61, %v4468_v46  ;;  %v4461_v40 = vld [vmem:[%s8664_s2 + $0x48] sm:$0xff]  ;;  %v4432_v41 = vld [vmem:[%s8663_s1 + $0x60] sm:$0xff]  ;;  %v4462_v46 = vld [vmem:[%s8664_s2 + $0x50] sm:$0xff] }
 0x452   : > { %v4471_v60 = vmul.f32 %v5802_v63, %v4439_v8  ;;  %4503 = vst.msk [vmem:[%s7040_s30 + $0x18] sm:$0xff] %vm377_vm1, %v4439_v8  ;;  %4534 = vrot.lane.b32.xlu0 %v4485_v50, %s6880_s16  ;;  %v8478_v37 = vpop.f32.mrb[17].mxu0 }
 0x453   : > { %v4470_v43 = vmul.f32 %v4438_v28, %v3208_v53  ;;  %4502 = vst.msk [vmem:[%s7040_s30 + $0x10] sm:$0xff] %vm377_vm1, %v4438_v28  ;;  %v5997_v58 = vpop.f32.mrb[8].mxu1  ;;  %v4431_v53 = vld [vmem:[%s8663_s1 + $0x58] sm:$0xff] }
 0x454   : > { %v4441_v62 = vmul.f32 %v5997_v58, %v4425_v21  ;;  %v4350_v57 = vpop.f32.mrb[9].mxu1  ;;  %v4487_v54 = vsub.f32 %v4455_v39, %v4471_v60  ;;  %v4435_v21 = vld [vmem:[%s8663_s1 + $0x78] sm:$0xff]  ;;  %v4434_v60 = vld [vmem:[%s8663_s1 + $0x70] sm:$0xff] }
 0x455   : > { %v4440_v26 = vmul.f32 %v4424_v35, %v4350_v57  ;;  %v8485_v32 = vpop.f32.mrb[18].mxu0  ;;  %v4486_v18 = vsub.f32 %v4454_v31, %v4470_v43  ;;  %v4463_v39 = vld [vmem:[%s8664_s2 + $0x58] sm:$0xff]  ;;  %v4464_v35 = vld [vmem:[%s8664_s2 + $0x60] sm:$0xff] }
 0x456   : > { %v4473_v49 = vmul.f32 %v5805_v47, %v4441_v62  ;;  %4505 = vst.msk [vmem:[%s7040_s30 + $0x28] sm:$0xff] %vm377_vm1, %v4441_v62  ;;  %4532 = vrot.lane.b32.xlu0 %v4484_v22, %s6880_s16  ;;  %4538 = vrot.lane.b32.xlu1 %v4487_v54, %s6880_s16  ;;  %v8497_v29 = vpop.f32.mrb[19].mxu0 }
 0x457   : > { %v4472_v59 = vmul.f32 %v4440_v26, %v3220_v24  ;;  %4504 = vst.msk [vmem:[%s7040_s30 + $0x20] sm:$0xff] %vm377_vm1, %v4440_v26  ;;  %v6000_v5 = vpop.f32.mrb[10].mxu1  ;;  %v4459_v24 = vld [vmem:[%s8664_s2 + $0x38] sm:$0xff]  ;;  %v4465_v26 = vld [vmem:[%s8664_s2 + $0x68] sm:$0xff] }
 0x458   : > { %v4443_v36 = vmul.f32 %v6000_v5, %v4427_v30  ;;  %v4362_v0 = vpop.f32.mrb[11].mxu1  ;;  %v4489_v44 = vsub.f32 %v4457_v19, %v4473_v49 }
 0x459   : > { %v4442_v20 = vmul.f32 %v4426_v34, %v4362_v0  ;;  %v4488_v4 = vsub.f32 %v4456_v25, %v4472_v59  ;;  %v4467_v34 = vld [vmem:[%s8664_s2 + $0x78] sm:$0xff] }
 0x45a   : > { %v4475_v33 = vmul.f32 %v5808_v3, %v4443_v36  ;;  %4507 = vst.msk [vmem:[%s7040_s30 + $0x38] sm:$0xff] %vm377_vm1, %v4443_v36  ;;  %4536 = vrot.lane.b32.xlu1 %v4486_v18, %s6880_s16 }
 0x45b   : > { %v4474_v9 = vmul.f32 %v4442_v20, %v8435_v45  ;;  %4506 = vst.msk [vmem:[%s7040_s30 + $0x30] sm:$0xff] %vm377_vm1, %v4442_v20  ;;  %v6003_v7 = vpop.f32.mrb[12].mxu1  ;;  %4540 = vrot.lane.b32.xlu0 %v4488_v4, %s6880_s16  ;;  %v4430_v45 = vld [vmem:[%s8663_s1 + $0x50] sm:$0xff] }
 0x45c   : > { %v4445_v1 = vmul.f32 %v6003_v7, %v4429_v23  ;;  %v4374_v6 = vpop.f32.mrb[13].mxu1  ;;  %v4491_v56 = vsub.f32 %v4459_v24, %v4475_v33 }
 0x45d   : > { %v4444_v63 = vmul.f32 %v4428_v16, %v4374_v6  ;;  %v4490_v47 = vsub.f32 %v4458_v27, %v4474_v9 }
 0x45e   : > { %v4477_v3 = vmul.f32 %v8437_v11, %v4445_v1  ;;  %4509 = vst.msk [vmem:[%s7040_s30 + $0x48] sm:$0xff] %vm377_vm1, %v4445_v1  ;;  %4542 = vrot.lane.b32.xlu1 %v4489_v44, %s6880_s16 }
 0x45f   : > { %v4476_v52 = vmul.f32 %v4444_v63, %v8442_v13  ;;  %4508 = vst.msk [vmem:[%s7040_s30 + $0x40] sm:$0xff] %vm377_vm1, %v4444_v63  ;;  %v6006_v38 = vpop.f32.mrb[14].mxu1  ;;  %4544 = vrot.lane.b32.xlu0 %v4490_v47, %s6880_s16 }
 0x460   : > { %v4447_v11 = vmul.f32 %v6006_v38, %v4431_v53  ;;  %v4386_v14 = vpop.f32.mrb[15].mxu1  ;;  %v4493_v50 = vsub.f32 %v4461_v40, %v4477_v3 }
 0x461   : > { %v4446_v51 = vmul.f32 %v4430_v45, %v4386_v14  ;;  %v4492_v15 = vsub.f32 %v4460_v10, %v4476_v52 }
 0x462   : > { %v4479_v13 = vmul.f32 %v8447_v12, %v4447_v11  ;;  %4511 = vst.msk [vmem:[%s7040_s30 + $0x58] sm:$0xff] %vm377_vm1, %v4447_v11  ;;  %4546 = vrot.lane.b32.xlu1 %v4491_v56, %s6880_s16 }
 0x463   : > { %v4478_v55 = vmul.f32 %v4446_v51, %v8457_v17  ;;  %4510 = vst.msk [vmem:[%s7040_s30 + $0x50] sm:$0xff] %vm377_vm1, %v4446_v51  ;;  %v6009_v8 = vpop.f32.mrb[16].mxu1  ;;  %4548 = vrot.lane.b32.xlu0 %v4492_v15, %s6880_s16 }
 0x464   : > { %v4449_v12 = vmul.f32 %v6009_v8, %v4433_v42  ;;  %v4398_v48 = vpop.f32.mrb[17].mxu1  ;;  %v4495_v57 = vsub.f32 %v4463_v39, %v4479_v13 }
 0x465   : > { %v4448_v28 = vmul.f32 %v4432_v41, %v4398_v48  ;;  %v4494_v61 = vsub.f32 %v4462_v46, %v4478_v55 }
 0x466   : > { %v4481_v17 = vmul.f32 %v8464_v2, %v4449_v12  ;;  %4513 = vst.msk [vmem:[%s7040_s30 + $0x68] sm:$0xff] %vm377_vm1, %v4449_v12  ;;  %4550 = vrot.lane.b32.xlu1 %v4493_v50, %s6880_s16 }
 0x467   : > { %v4480_v43 = vmul.f32 %v4448_v28, %v8478_v37  ;;  %4512 = vst.msk [vmem:[%s7040_s30 + $0x60] sm:$0xff] %vm377_vm1, %v4448_v28  ;;  %v6012_v58 = vpop.f32.mrb[18].mxu1  ;;  %4552 = vrot.lane.b32.xlu0 %v4494_v61, %s6880_s16  ;;  %v4466_v37 = vld [vmem:[%s8664_s2 + $0x70] sm:$0xff] }
 0x468   : > { %v4451_v2 = vmul.f32 %v6012_v58, %v4435_v21  ;;  %v4410_v62 = vpop.f32.mrb[19].mxu1  ;;  %v4497_v49 = vsub.f32 %v4465_v26, %v4481_v17 }
 0x469   : > { %v4450_v22 = vmul.f32 %v4434_v60, %v4410_v62  ;;  %v4496_v54 = vsub.f32 %v4464_v35, %v4480_v43 }
 0x46a   : > { %v4483_v30 = vmul.f32 %v8485_v32, %v4451_v2  ;;  %4515 = vst.msk [vmem:[%s7040_s30 + $0x78] sm:$0xff] %vm377_vm1, %v4451_v2  ;;  %4554 = vrot.lane.b32.xlu1 %v4495_v57, %s6880_s16 }
 0x46b   : > { %v4482_v31 = vmul.f32 %v4450_v22, %v8497_v29  ;;  %4514 = vst.msk [vmem:[%s7040_s30 + $0x70] sm:$0xff] %vm377_vm1, %v4450_v22  ;;  %4556 = vrot.lane.b32.xlu0 %v4496_v54, %s6880_s16 }
 0x46c   : > { %v4499_v25 = vsub.f32 %v4467_v34, %v4483_v30 }
 0x46d   : > { %v4498_v32 = vsub.f32 %v4466_v37, %v4482_v31 }
 0x46e   : > { %4558 = vrot.lane.b32.xlu1 %v4497_v49, %s6880_s16 }
 0x46f   : > { %4560 = vrot.lane.b32.xlu0 %v4498_v32, %s6880_s16 }
 0x472   : > { %4562 = vrot.lane.b32.xlu1 %v4499_v25, %s6880_s16 }
 0x4c4   : > { %v4535_v29 = vpop.permute.xlu0 %4534 }
 0x4c5   : > { %4582 = vst.msk [vmem:[%s7040_s30 + $0x8] sm:$0xff] %vm4580_vm3, %v4535_v29 }
 0x4c8   : > { %v4533_v59 = vpop.permute.xlu0 %4532  ;;  %v4539_v5 = vpop.permute.xlu1 %4538 }
 0x4c9   : > { %4581 = vst.msk [vmem:[%s7040_s30] sm:$0xff] %vm4580_vm3, %v4533_v59  ;;  %4584 = vst.msk [vmem:[%s7040_s30 + $0x18] sm:$0xff] %vm4580_vm3, %v4539_v5 }
 0x4cc   : > { %v4537_v36 = vpop.permute.xlu1 %4536 }
 0x4cd   : > { %4583 = vst.msk [vmem:[%s7040_s30 + $0x10] sm:$0xff] %vm4580_vm3, %v4537_v36  ;;  %v4541_v0 = vpop.permute.xlu0 %4540 }
 0x4ce   : > { %4585 = vst.msk [vmem:[%s7040_s30 + $0x20] sm:$0xff] %vm4580_vm3, %v4541_v0 }
 0x4d0   : > { %v4543_v18 = vpop.permute.xlu1 %4542 }
 0x4d1   : > { %4586 = vst.msk [vmem:[%s7040_s30 + $0x28] sm:$0xff] %vm4580_vm3, %v4543_v18  ;;  %v4545_v20 = vpop.permute.xlu0 %4544 }
 0x4d2   : > { %4587 = vst.msk [vmem:[%s7040_s30 + $0x30] sm:$0xff] %vm4580_vm3, %v4545_v20 }
 0x4d4   : > { %v4547_v23 = vpop.permute.xlu1 %4546 }
 0x4d5   : > { %4588 = vst.msk [vmem:[%s7040_s30 + $0x38] sm:$0xff] %vm4580_vm3, %v4547_v23  ;;  %v4549_v4 = vpop.permute.xlu0 %4548 }
 0x4d6   : > { %4589 = vst.msk [vmem:[%s7040_s30 + $0x40] sm:$0xff] %vm4580_vm3, %v4549_v4 }
 0x4d8   : > { %v4551_v19 = vpop.permute.xlu1 %4550 }
 0x4d9   : > { %4590 = vst.msk [vmem:[%s7040_s30 + $0x48] sm:$0xff] %vm4580_vm3, %v4551_v19  ;;  %v4553_v33 = vpop.permute.xlu0 %4552 }
 0x4da   : > { %4591 = vst.msk [vmem:[%s7040_s30 + $0x50] sm:$0xff] %vm4580_vm3, %v4553_v33 }
 0x4dc   : > { %v4555_v16 = vpop.permute.xlu1 %4554 }
 0x4dd   : > { %4592 = vst.msk [vmem:[%s7040_s30 + $0x58] sm:$0xff] %vm4580_vm3, %v4555_v16  ;;  %v4557_v27 = vpop.permute.xlu0 %4556 }
 0x4de   : > { %4593 = vst.msk [vmem:[%s7040_s30 + $0x60] sm:$0xff] %vm4580_vm3, %v4557_v27 }
 0x4e0   : > { %v4559_v9 = vpop.permute.xlu1 %4558 }
 0x4e1   : > { %4594 = vst.msk [vmem:[%s7040_s30 + $0x68] sm:$0xff] %vm4580_vm3, %v4559_v9  ;;  %v4561_v7 = vpop.permute.xlu0 %4560 }
 0x4e2   : > { %4595 = vst.msk [vmem:[%s7040_s30 + $0x70] sm:$0xff] %vm4580_vm3, %v4561_v7 }
 0x4e4   : > { %v4563_v1 = vpop.permute.xlu1 %4562 }
 0x4e5   : > { %4596 = vst.msk [vmem:[%s7040_s30 + $0x78] sm:$0xff] %vm4580_vm3, %v4563_v1 }
 0x4e6 PF: > { %s18_s25 = sadd.s32 1, %s6873_s25   ;;  %s8950_s16 = sld [smem:[#allocation7_spill]] }
 0x4e7   : > { %p15_p6 = scmp.ge.s32.totalorder %s18_s25, 6   ;;  %s8951_s18 = smov %s6849_s19 }
 0x4e8   : > { %s8952_s19 = smov %s6853_s20  ;;  %s8953_s20 = smov %s6978_s13 }
 0x4e9   : > { %s8954_s21 = smov %s6865_s23  ;;  %s8955_s22 = smov %s6869_s24 }
 0x4ea   : > { %s8957_s24 = smov %s8963_s28  ;;  %17 = sbr.rel (!%p15_p6) target bundleno = 5 (0x5), region = 88 }
 0x4ec   : > { %s8956_s23 = smov %s8950_s16 }
 0x4f1   :  { %4618 = vsyncpa [#allocation5], 1 }
 0x4f2   :  { %4620 = vsyncpa [#allocation5 + $0x1], 1 }

</bundles_post_ra>
